<compile_context>
chip_gen: v7x
topology: tpu7x:2x2x1
jax: 0.10.0
libtpu: 0.0.40
codegen_flags: <defaults>
</compile_context>

<pallas_src>
import math

import jax
import jax.numpy as jnp
from jax.experimental import pallas as pl
from jax.experimental.pallas import tpu as pltpu

D_MODEL = 32
NHEAD = 4
HEAD_DIM = D_MODEL // NHEAD
DIM_FF = 64
EPS = 1e-5

# stacked-MHA indices
PRIOR, SELF, TEXT = 0, 1, 2
# stacked-LayerNorm indices (norm1..norm4)
LN1, LN2, LN3, LN4 = 0, 1, 2, 3


def _decoder_layer_kernel(x_ref, mem_ref,
                          wqkv_ref, bqkv_ref, wo_ref, bo_ref,
                          lng_ref, lnb_ref,
                          w1_ref, b1_ref, w2_ref, b2_ref,
                          o_ref):
    """One grid step == one batch element. Everything is VMEM-resident."""
    D, H, dh = D_MODEL, NHEAD, HEAD_DIM
    scale = 1.0 / math.sqrt(dh)

    x = x_ref[0].astype(jnp.float32)      # (S, D)
    mem = mem_ref[0].astype(jnp.float32)  # (Sm, D)

    def mha(xq, xkv, i):
        # Packed QKV weights: wqkv_ref[i] is (D, 3D), bqkv_ref[i] is (1, 3D).
        wqkv = wqkv_ref[i]
        bqkv = bqkv_ref[i]
        if xq is xkv:
            # self / prior attention: single fused (S, D) @ (D, 3D) GEMM
            qkv = jnp.dot(xq, wqkv, preferred_element_type=jnp.float32) + bqkv
            q = qkv[:, :D]
            k = qkv[:, D:2 * D]
            v = qkv[:, 2 * D:]
        else:
            # cross attention: Q from tgt, K/V from memory (packed (D, 2D) GEMM)
            q = jnp.dot(xq, wqkv[:, :D],
                        preferred_element_type=jnp.float32) + bqkv[:, :D]
            kv = jnp.dot(xkv, wqkv[:, D:],
                         preferred_element_type=jnp.float32) + bqkv[:, D:]
            k = kv[:, :D]
            v = kv[:, D:]

        # Per-head attention (static unroll over H=4 tiny heads, no transposes
        # materialized: dot_general contracts the last axes directly).
        outs = []
        for h in range(H):
            lo, hi = h * dh, (h + 1) * dh
            qh = q[:, lo:hi]
            kh = k[:, lo:hi]
            vh = v[:, lo:hi]
            s = jax.lax.dot_general(
                qh, kh, (((1,), (1,)), ((), ())),
                preferred_element_type=jnp.float32) * scale
            s = s - jnp.max(s, axis=-1, keepdims=True)
            p = jnp.exp(s)
            p = p * pl.reciprocal(jnp.sum(p, axis=-1, keepdims=True),
                                  approx=True)
            outs.append(jnp.dot(p, vh, preferred_element_type=jnp.float32))
        o = jnp.concatenate(outs, axis=-1)                       # (Sq, D)
        return jnp.dot(o, wo_ref[i],
                       preferred_element_type=jnp.float32) + bo_ref[i]

    def add_ln(y, r, idx):
        z = y + r
        mu = jnp.mean(z, axis=-1, keepdims=True)
        var = jnp.mean((z - mu) ** 2, axis=-1, keepdims=True)
        zn = (z - mu) * jax.lax.rsqrt(var + EPS)
        return zn * lng_ref[idx] + lnb_ref[idx]

    # arch=1, norm_first=False
    x = add_ln(x, mha(x, x, PRIOR), LN4)
    x = add_ln(x, mha(x, x, SELF), LN1)
    x = add_ln(x, mha(x, mem, TEXT), LN2)

    h = jnp.dot(x, w1_ref[...], preferred_element_type=jnp.float32) + b1_ref[...]
    h = jnp.maximum(h, 0.0)
    f = jnp.dot(h, w2_ref[...], preferred_element_type=jnp.float32) + b2_ref[...]
    x = add_ln(x, f, LN3)

    o_ref[0] = x.astype(o_ref.dtype)


@jax.jit
def cdg_decoder_layer(tgt, memory, params):
    """tgt: (S, B, D), memory: (Sm, B, D)  (PyTorch batch_first=False layout)."""
    S, B, D = tgt.shape
    Sm = memory.shape[0]

    # Batch-major layout for the kernel (tiny one-time XLA transposes).
    x = jnp.transpose(tgt, (1, 0, 2))       # (B, S, D)
    m = jnp.transpose(memory, (1, 0, 2))    # (B, Sm, D)

    const = lambda *_: None  # noqa: E731  (placeholder, not used)

    out = pl.pallas_call(
        _decoder_layer_kernel,
        out_shape=jax.ShapeDtypeStruct((B, S, D), tgt.dtype),
        grid=(B,),
        in_specs=[
            pl.BlockSpec((1, S, D), lambda b: (b, 0, 0)),          # tgt slice
            pl.BlockSpec((1, Sm, D), lambda b: (b, 0, 0)),         # memory slice
            pl.BlockSpec((3, D, 3 * D), lambda b: (0, 0, 0)),      # wqkv (stacked)
            pl.BlockSpec((3, 1, 3 * D), lambda b: (0, 0, 0)),      # bqkv
            pl.BlockSpec((3, D, D), lambda b: (0, 0, 0)),          # wo
            pl.BlockSpec((3, 1, D), lambda b: (0, 0, 0)),          # bo
            pl.BlockSpec((4, 1, D), lambda b: (0, 0, 0)),          # ln gamma
            pl.BlockSpec((4, 1, D), lambda b: (0, 0, 0)),          # ln beta
            pl.BlockSpec((D, DIM_FF), lambda b: (0, 0)),           # w1
            pl.BlockSpec((1, DIM_FF), lambda b: (0, 0)),           # b1
            pl.BlockSpec((DIM_FF, D), lambda b: (0, 0)),           # w2
            pl.BlockSpec((1, D), lambda b: (0, 0)),                # b2
        ],
        out_specs=pl.BlockSpec((1, S, D), lambda b: (b, 0, 0)),
        compiler_params=pltpu.CompilerParams(
            dimension_semantics=("parallel",)),
    )(x, m,
      params["wqkv"], params["bqkv"], params["wo"], params["bo"],
      params["ln_g"], params["ln_b"],
      params["w1"], params["b1"], params["w2"], params["b2"])

    return jnp.transpose(out, (1, 0, 2))    # back to (S, B, D)


def init_params(key):
    def nrm(k, shape, scale=0.05):
        return scale * jax.random.normal(k, shape, dtype=jnp.float32)

    keys = jax.random.split(key, 8)
    ki = iter(keys)
    return {
        # stacked over (prior_msa, self_attn, text_attn)
        "wqkv": nrm(next(ki), (3, D_MODEL, 3 * D_MODEL)),
        "bqkv": nrm(next(ki), (3, 1, 3 * D_MODEL)),
        "wo": nrm(next(ki), (3, D_MODEL, D_MODEL)),
        "bo": nrm(next(ki), (3, 1, D_MODEL)),
        "w1": nrm(next(ki), (D_MODEL, DIM_FF)),
        "b1": nrm(next(ki), (1, DIM_FF)),
        "w2": nrm(next(ki), (DIM_FF, D_MODEL)),
        "b2": nrm(next(ki), (1, D_MODEL)),
        # stacked over (norm1, norm2, norm3, norm4)
        "ln_g": jnp.ones((4, 1, D_MODEL), jnp.float32),
        "ln_b": jnp.zeros((4, 1, D_MODEL), jnp.float32),
    }


def _reference(tgt, memory, params):
    """Pure-JAX reference (same math, exact softmax divide)."""
    S, B, D = tgt.shape
    H, dh = NHEAD, HEAD_DIM

    def mha(xq, xkv, i):
        Sq, Sk = xq.shape[0], xkv.shape[0]
        wqkv = params["wqkv"][i]
        bqkv = params["bqkv"][i][0]
        q = xq.reshape(Sq * B, D) @ wqkv[:, :D] + bqkv[:D]
        k = xkv.reshape(Sk * B, D) @ wqkv[:, D:2 * D] + bqkv[D:2 * D]
        v = xkv.reshape(Sk * B, D) @ wqkv[:, 2 * D:] + bqkv[2 * D:]
        q = q.reshape(Sq, B, H, dh).transpose(1, 2, 0, 3)
        k = k.reshape(Sk, B, H, dh).transpose(1, 2, 0, 3)
        v = v.reshape(Sk, B, H, dh).transpose(1, 2, 0, 3)
        s = jnp.einsum("bhqd,bhkd->bhqk", q, k) / math.sqrt(dh)
        p = jax.nn.softmax(s, axis=-1)
        o = jnp.einsum("bhqk,bhkd->bhqd", p, v)
        o = o.transpose(2, 0, 1, 3).reshape(Sq, B, D)
        return o @ params["wo"][i] + params["bo"][i][0]

    def add_ln(x, r, idx):
        y = x + r
        mu = jnp.mean(y, -1, keepdims=True)
        var = jnp.mean((y - mu) ** 2, -1, keepdims=True)
        return ((y - mu) / jnp.sqrt(var + EPS)
                * params["ln_g"][idx][0] + params["ln_b"][idx][0])

    x = tgt
    x = add_ln(x, mha(x, x, PRIOR), LN4)
    x = add_ln(x, mha(x, x, SELF), LN1)
    x = add_ln(x, mha(x, memory, TEXT), LN2)
    h = jnp.maximum(x.reshape(-1, D) @ params["w1"] + params["b1"], 0.0)
    f = (h @ params["w2"] + params["b2"]).reshape(S, B, D)
    x = add_ln(x, f, LN3)
    return x


if __name__ == "__main__":
    key = jax.random.PRNGKey(0)
    k_tgt, k_mem, k_par = jax.random.split(key, 3)

    S_TGT, S_MEM, BATCH = 8, 8, 2
    tgt = jax.random.normal(k_tgt, (S_TGT, BATCH, D_MODEL), dtype=jnp.float32)
    memory = jax.random.normal(k_mem, (S_MEM, BATCH, D_MODEL), dtype=jnp.float32)
    params = init_params(k_par)

    out = cdg_decoder_layer(tgt, memory, params)
    jax.block_until_ready(out)

    assert out.shape == (S_TGT, BATCH, D_MODEL)
    assert bool(jnp.all(jnp.isfinite(out)))

    ref = _reference(tgt, memory, params)
    # approx reciprocal in the in-kernel softmax -> allow a small tolerance
    assert float(jnp.max(jnp.abs(out - ref))) < 5e-2

    print("KERNEL_OK")
</pallas_src>

<mosaic_0001>
module attributes {stable_mosaic.version = 11 : i64} {
  func.func @_decoder_layer_kernel(%arg0: i32, %arg1: memref<1x8x32xf32, #tpu.memory_space<vmem>>, %arg2: memref<1x8x32xf32, #tpu.memory_space<vmem>>, %arg3: memref<3x32x96xf32, #tpu.memory_space<vmem>>, %arg4: memref<3x1x96xf32, #tpu.memory_space<vmem>>, %arg5: memref<3x32x32xf32, #tpu.memory_space<vmem>>, %arg6: memref<3x1x32xf32, #tpu.memory_space<vmem>>, %arg7: memref<4x1x32xf32, #tpu.memory_space<vmem>>, %arg8: memref<4x1x32xf32, #tpu.memory_space<vmem>>, %arg9: memref<32x64xf32, #tpu.memory_space<vmem>>, %arg10: memref<1x64xf32, #tpu.memory_space<vmem>>, %arg11: memref<64x32xf32, #tpu.memory_space<vmem>>, %arg12: memref<1x32xf32, #tpu.memory_space<vmem>>, %arg13: memref<1x8x32xf32, #tpu.memory_space<vmem>>) attributes {dimension_semantics = [#tpu.dimension_semantics<parallel>], iteration_bounds = array<i64: 2>, scalar_prefetch = 0 : i64, scratch_operands = 0 : i64, tpu.core_type = #tpu.core_type<tc>, window_params = [{transform_indices = @transform_0, window_bounds = array<i64: 1, 8, 32>}, {transform_indices = @transform_1, window_bounds = array<i64: 1, 8, 32>}, {pipeline_mode = #tpu.pipeline_mode<synchronous>, transform_indices = @transform_2, window_bounds = array<i64: 3, 32, 96>}, {pipeline_mode = #tpu.pipeline_mode<synchronous>, transform_indices = @transform_3, window_bounds = array<i64: 3, 1, 96>}, {pipeline_mode = #tpu.pipeline_mode<synchronous>, transform_indices = @transform_4, window_bounds = array<i64: 3, 32, 32>}, {pipeline_mode = #tpu.pipeline_mode<synchronous>, transform_indices = @transform_5, window_bounds = array<i64: 3, 1, 32>}, {pipeline_mode = #tpu.pipeline_mode<synchronous>, transform_indices = @transform_6, window_bounds = array<i64: 4, 1, 32>}, {pipeline_mode = #tpu.pipeline_mode<synchronous>, transform_indices = @transform_7, window_bounds = array<i64: 4, 1, 32>}, {pipeline_mode = #tpu.pipeline_mode<synchronous>, transform_indices = @transform_8, window_bounds = array<i64: 32, 64>}, {pipeline_mode = #tpu.pipeline_mode<synchronous>, transform_indices = @transform_9, window_bounds = array<i64: 1, 64>}, {pipeline_mode = #tpu.pipeline_mode<synchronous>, transform_indices = @transform_10, window_bounds = array<i64: 64, 32>}, {pipeline_mode = #tpu.pipeline_mode<synchronous>, transform_indices = @transform_11, window_bounds = array<i64: 1, 32>}, {transform_indices = @transform_12, window_bounds = array<i64: 1, 8, 32>}]} {
    %c0 = arith.constant 0 : index
    %c0_0 = arith.constant 0 : index
    %c0_1 = arith.constant 0 : index
    %0 = vector.load %arg1[%c0, %c0_0, %c0_1] : memref<1x8x32xf32, #tpu.memory_space<vmem>>, vector<1x8x32xf32>
    %1 = vector.shape_cast %0 : vector<1x8x32xf32> to vector<8x32xf32>
    %c0_2 = arith.constant 0 : index
    %c0_3 = arith.constant 0 : index
    %c0_4 = arith.constant 0 : index
    %2 = vector.load %arg2[%c0_2, %c0_3, %c0_4] : memref<1x8x32xf32, #tpu.memory_space<vmem>>, vector<1x8x32xf32>
    %3 = vector.shape_cast %2 : vector<1x8x32xf32> to vector<8x32xf32>
    %c0_5 = arith.constant 0 : index
    %c0_6 = arith.constant 0 : index
    %c0_7 = arith.constant 0 : index
    %4 = vector.load %arg3[%c0_5, %c0_6, %c0_7] : memref<3x32x96xf32, #tpu.memory_space<vmem>>, vector<1x32x96xf32>
    %5 = vector.shape_cast %4 : vector<1x32x96xf32> to vector<32x96xf32>
    %c0_8 = arith.constant 0 : index
    %c0_9 = arith.constant 0 : index
    %c0_10 = arith.constant 0 : index
    %6 = vector.load %arg4[%c0_8, %c0_9, %c0_10] : memref<3x1x96xf32, #tpu.memory_space<vmem>>, vector<1x1x96xf32>
    %7 = vector.shape_cast %6 : vector<1x1x96xf32> to vector<1x96xf32>
    %cst = arith.constant dense<0.000000e+00> : vector<8x96xf32>
    %8 = tpu.matmul %1, %5, %cst {dimension_numbers = #tpu.dot_dimension_numbers<[1], [0], [0], [1], [0, 0, 1, 1], [], []>} : vector<8x32xf32>, vector<32x96xf32>, vector<8x96xf32> -> vector<8x96xf32>
    %9 = vector.broadcast %7 : vector<1x96xf32> to vector<8x96xf32>
    %10 = arith.addf %8, %9 : vector<8x96xf32>
    %11 = vector.extract_strided_slice %10 {offsets = [0, 0], sizes = [8, 32], strides = [1, 1]} : vector<8x96xf32> to vector<8x32xf32>
    %12 = vector.extract_strided_slice %10 {offsets = [0, 32], sizes = [8, 32], strides = [1, 1]} : vector<8x96xf32> to vector<8x32xf32>
    %13 = vector.extract_strided_slice %10 {offsets = [0, 64], sizes = [8, 32], strides = [1, 1]} : vector<8x96xf32> to vector<8x32xf32>
    %14 = vector.extract_strided_slice %11 {offsets = [0, 0], sizes = [8, 8], strides = [1, 1]} : vector<8x32xf32> to vector<8x8xf32>
    %15 = vector.extract_strided_slice %12 {offsets = [0, 0], sizes = [8, 8], strides = [1, 1]} : vector<8x32xf32> to vector<8x8xf32>
    %16 = vector.extract_strided_slice %13 {offsets = [0, 0], sizes = [8, 8], strides = [1, 1]} : vector<8x32xf32> to vector<8x8xf32>
    %cst_11 = arith.constant dense<0.000000e+00> : vector<8x8xf32>
    %17 = tpu.matmul %14, %15, %cst_11 {dimension_numbers = #tpu.dot_dimension_numbers<[1], [1], [0], [0], [0, 0, 1, 0], [], []>} : vector<8x8xf32>, vector<8x8xf32>, vector<8x8xf32> -> vector<8x8xf32>
    %cst_12 = arith.constant 0.353553385 : f32
    %18 = vector.broadcast %cst_12 : f32 to vector<8x8xf32>
    %19 = arith.mulf %17, %18 : vector<8x8xf32>
    %cst_13 = arith.constant dense<0xFF800000> : vector<8xf32>
    %20 = vector.multi_reduction <maximumf>, %19, %cst_13 [1] : vector<8x8xf32> to vector<8xf32>
    %21 = vector.shape_cast %20 : vector<8xf32> to vector<8x1xf32>
    %22 = vector.broadcast %21 : vector<8x1xf32> to vector<8x8xf32>
    %23 = arith.subf %19, %22 : vector<8x8xf32>
    %24 = math.exp %23 : vector<8x8xf32>
    %cst_14 = arith.constant dense<0.000000e+00> : vector<8xf32>
    %25 = vector.multi_reduction <add>, %24, %cst_14 [1] : vector<8x8xf32> to vector<8xf32>
    %26 = vector.shape_cast %25 : vector<8xf32> to vector<8x1xf32>
    %27 = tpu.reciprocal %26 {approx = true} : vector<8x1xf32> -> vector<8x1xf32>
    %28 = vector.broadcast %27 : vector<8x1xf32> to vector<8x8xf32>
    %29 = arith.mulf %24, %28 : vector<8x8xf32>
    %cst_15 = arith.constant dense<0.000000e+00> : vector<8x8xf32>
    %30 = tpu.matmul %29, %16, %cst_15 {dimension_numbers = #tpu.dot_dimension_numbers<[1], [0], [0], [1], [0, 0, 1, 1], [], []>} : vector<8x8xf32>, vector<8x8xf32>, vector<8x8xf32> -> vector<8x8xf32>
    %31 = vector.extract_strided_slice %11 {offsets = [0, 8], sizes = [8, 8], strides = [1, 1]} : vector<8x32xf32> to vector<8x8xf32>
    %32 = vector.extract_strided_slice %12 {offsets = [0, 8], sizes = [8, 8], strides = [1, 1]} : vector<8x32xf32> to vector<8x8xf32>
    %33 = vector.extract_strided_slice %13 {offsets = [0, 8], sizes = [8, 8], strides = [1, 1]} : vector<8x32xf32> to vector<8x8xf32>
    %cst_16 = arith.constant dense<0.000000e+00> : vector<8x8xf32>
    %34 = tpu.matmul %31, %32, %cst_16 {dimension_numbers = #tpu.dot_dimension_numbers<[1], [1], [0], [0], [0, 0, 1, 0], [], []>} : vector<8x8xf32>, vector<8x8xf32>, vector<8x8xf32> -> vector<8x8xf32>
    %cst_17 = arith.constant 0.353553385 : f32
    %35 = vector.broadcast %cst_17 : f32 to vector<8x8xf32>
    %36 = arith.mulf %34, %35 : vector<8x8xf32>
    %cst_18 = arith.constant dense<0xFF800000> : vector<8xf32>
    %37 = vector.multi_reduction <maximumf>, %36, %cst_18 [1] : vector<8x8xf32> to vector<8xf32>
    %38 = vector.shape_cast %37 : vector<8xf32> to vector<8x1xf32>
    %39 = vector.broadcast %38 : vector<8x1xf32> to vector<8x8xf32>
    %40 = arith.subf %36, %39 : vector<8x8xf32>
    %41 = math.exp %40 : vector<8x8xf32>
    %cst_19 = arith.constant dense<0.000000e+00> : vector<8xf32>
    %42 = vector.multi_reduction <add>, %41, %cst_19 [1] : vector<8x8xf32> to vector<8xf32>
    %43 = vector.shape_cast %42 : vector<8xf32> to vector<8x1xf32>
    %44 = tpu.reciprocal %43 {approx = true} : vector<8x1xf32> -> vector<8x1xf32>
    %45 = vector.broadcast %44 : vector<8x1xf32> to vector<8x8xf32>
    %46 = arith.mulf %41, %45 : vector<8x8xf32>
    %cst_20 = arith.constant dense<0.000000e+00> : vector<8x8xf32>
    %47 = tpu.matmul %46, %33, %cst_20 {dimension_numbers = #tpu.dot_dimension_numbers<[1], [0], [0], [1], [0, 0, 1, 1], [], []>} : vector<8x8xf32>, vector<8x8xf32>, vector<8x8xf32> -> vector<8x8xf32>
    %48 = vector.extract_strided_slice %11 {offsets = [0, 16], sizes = [8, 8], strides = [1, 1]} : vector<8x32xf32> to vector<8x8xf32>
    %49 = vector.extract_strided_slice %12 {offsets = [0, 16], sizes = [8, 8], strides = [1, 1]} : vector<8x32xf32> to vector<8x8xf32>
    %50 = vector.extract_strided_slice %13 {offsets = [0, 16], sizes = [8, 8], strides = [1, 1]} : vector<8x32xf32> to vector<8x8xf32>
    %cst_21 = arith.constant dense<0.000000e+00> : vector<8x8xf32>
    %51 = tpu.matmul %48, %49, %cst_21 {dimension_numbers = #tpu.dot_dimension_numbers<[1], [1], [0], [0], [0, 0, 1, 0], [], []>} : vector<8x8xf32>, vector<8x8xf32>, vector<8x8xf32> -> vector<8x8xf32>
    %cst_22 = arith.constant 0.353553385 : f32
    %52 = vector.broadcast %cst_22 : f32 to vector<8x8xf32>
    %53 = arith.mulf %51, %52 : vector<8x8xf32>
    %cst_23 = arith.constant dense<0xFF800000> : vector<8xf32>
    %54 = vector.multi_reduction <maximumf>, %53, %cst_23 [1] : vector<8x8xf32> to vector<8xf32>
    %55 = vector.shape_cast %54 : vector<8xf32> to vector<8x1xf32>
    %56 = vector.broadcast %55 : vector<8x1xf32> to vector<8x8xf32>
    %57 = arith.subf %53, %56 : vector<8x8xf32>
    %58 = math.exp %57 : vector<8x8xf32>
    %cst_24 = arith.constant dense<0.000000e+00> : vector<8xf32>
    %59 = vector.multi_reduction <add>, %58, %cst_24 [1] : vector<8x8xf32> to vector<8xf32>
    %60 = vector.shape_cast %59 : vector<8xf32> to vector<8x1xf32>
    %61 = tpu.reciprocal %60 {approx = true} : vector<8x1xf32> -> vector<8x1xf32>
    %62 = vector.broadcast %61 : vector<8x1xf32> to vector<8x8xf32>
    %63 = arith.mulf %58, %62 : vector<8x8xf32>
    %cst_25 = arith.constant dense<0.000000e+00> : vector<8x8xf32>
    %64 = tpu.matmul %63, %50, %cst_25 {dimension_numbers = #tpu.dot_dimension_numbers<[1], [0], [0], [1], [0, 0, 1, 1], [], []>} : vector<8x8xf32>, vector<8x8xf32>, vector<8x8xf32> -> vector<8x8xf32>
    %65 = vector.extract_strided_slice %11 {offsets = [0, 24], sizes = [8, 8], strides = [1, 1]} : vector<8x32xf32> to vector<8x8xf32>
    %66 = vector.extract_strided_slice %12 {offsets = [0, 24], sizes = [8, 8], strides = [1, 1]} : vector<8x32xf32> to vector<8x8xf32>
    %67 = vector.extract_strided_slice %13 {offsets = [0, 24], sizes = [8, 8], strides = [1, 1]} : vector<8x32xf32> to vector<8x8xf32>
    %cst_26 = arith.constant dense<0.000000e+00> : vector<8x8xf32>
    %68 = tpu.matmul %65, %66, %cst_26 {dimension_numbers = #tpu.dot_dimension_numbers<[1], [1], [0], [0], [0, 0, 1, 0], [], []>} : vector<8x8xf32>, vector<8x8xf32>, vector<8x8xf32> -> vector<8x8xf32>
    %cst_27 = arith.constant 0.353553385 : f32
    %69 = vector.broadcast %cst_27 : f32 to vector<8x8xf32>
    %70 = arith.mulf %68, %69 : vector<8x8xf32>
    %cst_28 = arith.constant dense<0xFF800000> : vector<8xf32>
    %71 = vector.multi_reduction <maximumf>, %70, %cst_28 [1] : vector<8x8xf32> to vector<8xf32>
    %72 = vector.shape_cast %71 : vector<8xf32> to vector<8x1xf32>
    %73 = vector.broadcast %72 : vector<8x1xf32> to vector<8x8xf32>
    %74 = arith.subf %70, %73 : vector<8x8xf32>
    %75 = math.exp %74 : vector<8x8xf32>
    %cst_29 = arith.constant dense<0.000000e+00> : vector<8xf32>
    %76 = vector.multi_reduction <add>, %75, %cst_29 [1] : vector<8x8xf32> to vector<8xf32>
    %77 = vector.shape_cast %76 : vector<8xf32> to vector<8x1xf32>
    %78 = tpu.reciprocal %77 {approx = true} : vector<8x1xf32> -> vector<8x1xf32>
    %79 = vector.broadcast %78 : vector<8x1xf32> to vector<8x8xf32>
    %80 = arith.mulf %75, %79 : vector<8x8xf32>
    %cst_30 = arith.constant dense<0.000000e+00> : vector<8x8xf32>
    %81 = tpu.matmul %80, %67, %cst_30 {dimension_numbers = #tpu.dot_dimension_numbers<[1], [0], [0], [1], [0, 0, 1, 1], [], []>} : vector<8x8xf32>, vector<8x8xf32>, vector<8x8xf32> -> vector<8x8xf32>
    %82 = tpu.concatenate %30, %47, %64, %81 in 1 : vector<8x8xf32>, vector<8x8xf32>, vector<8x8xf32>, vector<8x8xf32> -> vector<8x32xf32>
    %c0_31 = arith.constant 0 : index
    %c0_32 = arith.constant 0 : index
    %c0_33 = arith.constant 0 : index
    %83 = vector.load %arg5[%c0_31, %c0_32, %c0_33] : memref<3x32x32xf32, #tpu.memory_space<vmem>>, vector<1x32x32xf32>
    %84 = vector.shape_cast %83 : vector<1x32x32xf32> to vector<32x32xf32>
    %cst_34 = arith.constant dense<0.000000e+00> : vector<8x32xf32>
    %85 = tpu.matmul %82, %84, %cst_34 {dimension_numbers = #tpu.dot_dimension_numbers<[1], [0], [0], [1], [0, 0, 1, 1], [], []>} : vector<8x32xf32>, vector<32x32xf32>, vector<8x32xf32> -> vector<8x32xf32>
    %c0_35 = arith.constant 0 : index
    %c0_36 = arith.constant 0 : index
    %c0_37 = arith.constant 0 : index
    %86 = vector.load %arg6[%c0_35, %c0_36, %c0_37] : memref<3x1x32xf32, #tpu.memory_space<vmem>>, vector<1x1x32xf32>
    %87 = vector.shape_cast %86 : vector<1x1x32xf32> to vector<1x32xf32>
    %88 = vector.broadcast %87 : vector<1x32xf32> to vector<8x32xf32>
    %89 = arith.addf %85, %88 : vector<8x32xf32>
    %90 = arith.addf %1, %89 : vector<8x32xf32>
    %cst_38 = arith.constant dense<0.000000e+00> : vector<8xf32>
    %91 = vector.multi_reduction <add>, %90, %cst_38 [1] : vector<8x32xf32> to vector<8xf32>
    %92 = vector.shape_cast %91 : vector<8xf32> to vector<8x1xf32>
    %cst_39 = arith.constant 3.200000e+01 : f32
    %93 = vector.broadcast %cst_39 : f32 to vector<8x1xf32>
    %94 = arith.divf %92, %93 : vector<8x1xf32>
    %95 = vector.broadcast %94 : vector<8x1xf32> to vector<8x32xf32>
    %96 = arith.subf %90, %95 : vector<8x32xf32>
    %97 = arith.mulf %96, %96 : vector<8x32xf32>
    %cst_40 = arith.constant dense<0.000000e+00> : vector<8xf32>
    %98 = vector.multi_reduction <add>, %97, %cst_40 [1] : vector<8x32xf32> to vector<8xf32>
    %99 = vector.shape_cast %98 : vector<8xf32> to vector<8x1xf32>
    %cst_41 = arith.constant 3.200000e+01 : f32
    %100 = vector.broadcast %cst_41 : f32 to vector<8x1xf32>
    %101 = arith.divf %99, %100 : vector<8x1xf32>
    %102 = vector.broadcast %94 : vector<8x1xf32> to vector<8x32xf32>
    %103 = arith.subf %90, %102 : vector<8x32xf32>
    %cst_42 = arith.constant 9.99999974E-6 : f32
    %104 = vector.broadcast %cst_42 : f32 to vector<8x1xf32>
    %105 = arith.addf %101, %104 : vector<8x1xf32>
    %106 = math.rsqrt %105 : vector<8x1xf32>
    %107 = vector.broadcast %106 : vector<8x1xf32> to vector<8x32xf32>
    %108 = arith.mulf %103, %107 : vector<8x32xf32>
    %c3 = arith.constant 3 : index
    %c0_43 = arith.constant 0 : index
    %c0_44 = arith.constant 0 : index
    %109 = vector.load %arg7[%c3, %c0_43, %c0_44] : memref<4x1x32xf32, #tpu.memory_space<vmem>>, vector<1x1x32xf32>
    %110 = vector.shape_cast %109 : vector<1x1x32xf32> to vector<1x32xf32>
    %111 = vector.broadcast %110 : vector<1x32xf32> to vector<8x32xf32>
    %112 = arith.mulf %108, %111 : vector<8x32xf32>
    %c3_45 = arith.constant 3 : index
    %c0_46 = arith.constant 0 : index
    %c0_47 = arith.constant 0 : index
    %113 = vector.load %arg8[%c3_45, %c0_46, %c0_47] : memref<4x1x32xf32, #tpu.memory_space<vmem>>, vector<1x1x32xf32>
    %114 = vector.shape_cast %113 : vector<1x1x32xf32> to vector<1x32xf32>
    %115 = vector.broadcast %114 : vector<1x32xf32> to vector<8x32xf32>
    %116 = arith.addf %112, %115 : vector<8x32xf32>
    %c1 = arith.constant 1 : index
    %c0_48 = arith.constant 0 : index
    %c0_49 = arith.constant 0 : index
    %117 = vector.load %arg3[%c1, %c0_48, %c0_49] : memref<3x32x96xf32, #tpu.memory_space<vmem>>, vector<1x32x96xf32>
    %118 = vector.shape_cast %117 : vector<1x32x96xf32> to vector<32x96xf32>
    %c1_50 = arith.constant 1 : index
    %c0_51 = arith.constant 0 : index
    %c0_52 = arith.constant 0 : index
    %119 = vector.load %arg4[%c1_50, %c0_51, %c0_52] : memref<3x1x96xf32, #tpu.memory_space<vmem>>, vector<1x1x96xf32>
    %120 = vector.shape_cast %119 : vector<1x1x96xf32> to vector<1x96xf32>
    %cst_53 = arith.constant dense<0.000000e+00> : vector<8x96xf32>
    %121 = tpu.matmul %116, %118, %cst_53 {dimension_numbers = #tpu.dot_dimension_numbers<[1], [0], [0], [1], [0, 0, 1, 1], [], []>} : vector<8x32xf32>, vector<32x96xf32>, vector<8x96xf32> -> vector<8x96xf32>
    %122 = vector.broadcast %120 : vector<1x96xf32> to vector<8x96xf32>
    %123 = arith.addf %121, %122 : vector<8x96xf32>
    %124 = vector.extract_strided_slice %123 {offsets = [0, 0], sizes = [8, 32], strides = [1, 1]} : vector<8x96xf32> to vector<8x32xf32>
    %125 = vector.extract_strided_slice %123 {offsets = [0, 32], sizes = [8, 32], strides = [1, 1]} : vector<8x96xf32> to vector<8x32xf32>
    %126 = vector.extract_strided_slice %123 {offsets = [0, 64], sizes = [8, 32], strides = [1, 1]} : vector<8x96xf32> to vector<8x32xf32>
    %127 = vector.extract_strided_slice %124 {offsets = [0, 0], sizes = [8, 8], strides = [1, 1]} : vector<8x32xf32> to vector<8x8xf32>
    %128 = vector.extract_strided_slice %125 {offsets = [0, 0], sizes = [8, 8], strides = [1, 1]} : vector<8x32xf32> to vector<8x8xf32>
    %129 = vector.extract_strided_slice %126 {offsets = [0, 0], sizes = [8, 8], strides = [1, 1]} : vector<8x32xf32> to vector<8x8xf32>
    %cst_54 = arith.constant dense<0.000000e+00> : vector<8x8xf32>
    %130 = tpu.matmul %127, %128, %cst_54 {dimension_numbers = #tpu.dot_dimension_numbers<[1], [1], [0], [0], [0, 0, 1, 0], [], []>} : vector<8x8xf32>, vector<8x8xf32>, vector<8x8xf32> -> vector<8x8xf32>
    %cst_55 = arith.constant 0.353553385 : f32
    %131 = vector.broadcast %cst_55 : f32 to vector<8x8xf32>
    %132 = arith.mulf %130, %131 : vector<8x8xf32>
    %cst_56 = arith.constant dense<0xFF800000> : vector<8xf32>
    %133 = vector.multi_reduction <maximumf>, %132, %cst_56 [1] : vector<8x8xf32> to vector<8xf32>
    %134 = vector.shape_cast %133 : vector<8xf32> to vector<8x1xf32>
    %135 = vector.broadcast %134 : vector<8x1xf32> to vector<8x8xf32>
    %136 = arith.subf %132, %135 : vector<8x8xf32>
    %137 = math.exp %136 : vector<8x8xf32>
    %cst_57 = arith.constant dense<0.000000e+00> : vector<8xf32>
    %138 = vector.multi_reduction <add>, %137, %cst_57 [1] : vector<8x8xf32> to vector<8xf32>
    %139 = vector.shape_cast %138 : vector<8xf32> to vector<8x1xf32>
    %140 = tpu.reciprocal %139 {approx = true} : vector<8x1xf32> -> vector<8x1xf32>
    %141 = vector.broadcast %140 : vector<8x1xf32> to vector<8x8xf32>
    %142 = arith.mulf %137, %141 : vector<8x8xf32>
    %cst_58 = arith.constant dense<0.000000e+00> : vector<8x8xf32>
    %143 = tpu.matmul %142, %129, %cst_58 {dimension_numbers = #tpu.dot_dimension_numbers<[1], [0], [0], [1], [0, 0, 1, 1], [], []>} : vector<8x8xf32>, vector<8x8xf32>, vector<8x8xf32> -> vector<8x8xf32>
    %144 = vector.extract_strided_slice %124 {offsets = [0, 8], sizes = [8, 8], strides = [1, 1]} : vector<8x32xf32> to vector<8x8xf32>
    %145 = vector.extract_strided_slice %125 {offsets = [0, 8], sizes = [8, 8], strides = [1, 1]} : vector<8x32xf32> to vector<8x8xf32>
    %146 = vector.extract_strided_slice %126 {offsets = [0, 8], sizes = [8, 8], strides = [1, 1]} : vector<8x32xf32> to vector<8x8xf32>
    %cst_59 = arith.constant dense<0.000000e+00> : vector<8x8xf32>
    %147 = tpu.matmul %144, %145, %cst_59 {dimension_numbers = #tpu.dot_dimension_numbers<[1], [1], [0], [0], [0, 0, 1, 0], [], []>} : vector<8x8xf32>, vector<8x8xf32>, vector<8x8xf32> -> vector<8x8xf32>
    %cst_60 = arith.constant 0.353553385 : f32
    %148 = vector.broadcast %cst_60 : f32 to vector<8x8xf32>
    %149 = arith.mulf %147, %148 : vector<8x8xf32>
    %cst_61 = arith.constant dense<0xFF800000> : vector<8xf32>
    %150 = vector.multi_reduction <maximumf>, %149, %cst_61 [1] : vector<8x8xf32> to vector<8xf32>
    %151 = vector.shape_cast %150 : vector<8xf32> to vector<8x1xf32>
    %152 = vector.broadcast %151 : vector<8x1xf32> to vector<8x8xf32>
    %153 = arith.subf %149, %152 : vector<8x8xf32>
    %154 = math.exp %153 : vector<8x8xf32>
    %cst_62 = arith.constant dense<0.000000e+00> : vector<8xf32>
    %155 = vector.multi_reduction <add>, %154, %cst_62 [1] : vector<8x8xf32> to vector<8xf32>
    %156 = vector.shape_cast %155 : vector<8xf32> to vector<8x1xf32>
    %157 = tpu.reciprocal %156 {approx = true} : vector<8x1xf32> -> vector<8x1xf32>
    %158 = vector.broadcast %157 : vector<8x1xf32> to vector<8x8xf32>
    %159 = arith.mulf %154, %158 : vector<8x8xf32>
    %cst_63 = arith.constant dense<0.000000e+00> : vector<8x8xf32>
    %160 = tpu.matmul %159, %146, %cst_63 {dimension_numbers = #tpu.dot_dimension_numbers<[1], [0], [0], [1], [0, 0, 1, 1], [], []>} : vector<8x8xf32>, vector<8x8xf32>, vector<8x8xf32> -> vector<8x8xf32>
    %161 = vector.extract_strided_slice %124 {offsets = [0, 16], sizes = [8, 8], strides = [1, 1]} : vector<8x32xf32> to vector<8x8xf32>
    %162 = vector.extract_strided_slice %125 {offsets = [0, 16], sizes = [8, 8], strides = [1, 1]} : vector<8x32xf32> to vector<8x8xf32>
    %163 = vector.extract_strided_slice %126 {offsets = [0, 16], sizes = [8, 8], strides = [1, 1]} : vector<8x32xf32> to vector<8x8xf32>
    %cst_64 = arith.constant dense<0.000000e+00> : vector<8x8xf32>
    %164 = tpu.matmul %161, %162, %cst_64 {dimension_numbers = #tpu.dot_dimension_numbers<[1], [1], [0], [0], [0, 0, 1, 0], [], []>} : vector<8x8xf32>, vector<8x8xf32>, vector<8x8xf32> -> vector<8x8xf32>
    %cst_65 = arith.constant 0.353553385 : f32
    %165 = vector.broadcast %cst_65 : f32 to vector<8x8xf32>
    %166 = arith.mulf %164, %165 : vector<8x8xf32>
    %cst_66 = arith.constant dense<0xFF800000> : vector<8xf32>
    %167 = vector.multi_reduction <maximumf>, %166, %cst_66 [1] : vector<8x8xf32> to vector<8xf32>
    %168 = vector.shape_cast %167 : vector<8xf32> to vector<8x1xf32>
    %169 = vector.broadcast %168 : vector<8x1xf32> to vector<8x8xf32>
    %170 = arith.subf %166, %169 : vector<8x8xf32>
    %171 = math.exp %170 : vector<8x8xf32>
    %cst_67 = arith.constant dense<0.000000e+00> : vector<8xf32>
    %172 = vector.multi_reduction <add>, %171, %cst_67 [1] : vector<8x8xf32> to vector<8xf32>
    %173 = vector.shape_cast %172 : vector<8xf32> to vector<8x1xf32>
    %174 = tpu.reciprocal %173 {approx = true} : vector<8x1xf32> -> vector<8x1xf32>
    %175 = vector.broadcast %174 : vector<8x1xf32> to vector<8x8xf32>
    %176 = arith.mulf %171, %175 : vector<8x8xf32>
    %cst_68 = arith.constant dense<0.000000e+00> : vector<8x8xf32>
    %177 = tpu.matmul %176, %163, %cst_68 {dimension_numbers = #tpu.dot_dimension_numbers<[1], [0], [0], [1], [0, 0, 1, 1], [], []>} : vector<8x8xf32>, vector<8x8xf32>, vector<8x8xf32> -> vector<8x8xf32>
    %178 = vector.extract_strided_slice %124 {offsets = [0, 24], sizes = [8, 8], strides = [1, 1]} : vector<8x32xf32> to vector<8x8xf32>
    %179 = vector.extract_strided_slice %125 {offsets = [0, 24], sizes = [8, 8], strides = [1, 1]} : vector<8x32xf32> to vector<8x8xf32>
    %180 = vector.extract_strided_slice %126 {offsets = [0, 24], sizes = [8, 8], strides = [1, 1]} : vector<8x32xf32> to vector<8x8xf32>
    %cst_69 = arith.constant dense<0.000000e+00> : vector<8x8xf32>
    %181 = tpu.matmul %178, %179, %cst_69 {dimension_numbers = #tpu.dot_dimension_numbers<[1], [1], [0], [0], [0, 0, 1, 0], [], []>} : vector<8x8xf32>, vector<8x8xf32>, vector<8x8xf32> -> vector<8x8xf32>
    %cst_70 = arith.constant 0.353553385 : f32
    %182 = vector.broadcast %cst_70 : f32 to vector<8x8xf32>
    %183 = arith.mulf %181, %182 : vector<8x8xf32>
    %cst_71 = arith.constant dense<0xFF800000> : vector<8xf32>
    %184 = vector.multi_reduction <maximumf>, %183, %cst_71 [1] : vector<8x8xf32> to vector<8xf32>
    %185 = vector.shape_cast %184 : vector<8xf32> to vector<8x1xf32>
    %186 = vector.broadcast %185 : vector<8x1xf32> to vector<8x8xf32>
    %187 = arith.subf %183, %186 : vector<8x8xf32>
    %188 = math.exp %187 : vector<8x8xf32>
    %cst_72 = arith.constant dense<0.000000e+00> : vector<8xf32>
    %189 = vector.multi_reduction <add>, %188, %cst_72 [1] : vector<8x8xf32> to vector<8xf32>
    %190 = vector.shape_cast %189 : vector<8xf32> to vector<8x1xf32>
    %191 = tpu.reciprocal %190 {approx = true} : vector<8x1xf32> -> vector<8x1xf32>
    %192 = vector.broadcast %191 : vector<8x1xf32> to vector<8x8xf32>
    %193 = arith.mulf %188, %192 : vector<8x8xf32>
    %cst_73 = arith.constant dense<0.000000e+00> : vector<8x8xf32>
    %194 = tpu.matmul %193, %180, %cst_73 {dimension_numbers = #tpu.dot_dimension_numbers<[1], [0], [0], [1], [0, 0, 1, 1], [], []>} : vector<8x8xf32>, vector<8x8xf32>, vector<8x8xf32> -> vector<8x8xf32>
    %195 = tpu.concatenate %143, %160, %177, %194 in 1 : vector<8x8xf32>, vector<8x8xf32>, vector<8x8xf32>, vector<8x8xf32> -> vector<8x32xf32>
    %c1_74 = arith.constant 1 : index
    %c0_75 = arith.constant 0 : index
    %c0_76 = arith.constant 0 : index
    %196 = vector.load %arg5[%c1_74, %c0_75, %c0_76] : memref<3x32x32xf32, #tpu.memory_space<vmem>>, vector<1x32x32xf32>
    %197 = vector.shape_cast %196 : vector<1x32x32xf32> to vector<32x32xf32>
    %cst_77 = arith.constant dense<0.000000e+00> : vector<8x32xf32>
    %198 = tpu.matmul %195, %197, %cst_77 {dimension_numbers = #tpu.dot_dimension_numbers<[1], [0], [0], [1], [0, 0, 1, 1], [], []>} : vector<8x32xf32>, vector<32x32xf32>, vector<8x32xf32> -> vector<8x32xf32>
    %c1_78 = arith.constant 1 : index
    %c0_79 = arith.constant 0 : index
    %c0_80 = arith.constant 0 : index
    %199 = vector.load %arg6[%c1_78, %c0_79, %c0_80] : memref<3x1x32xf32, #tpu.memory_space<vmem>>, vector<1x1x32xf32>
    %200 = vector.shape_cast %199 : vector<1x1x32xf32> to vector<1x32xf32>
    %201 = vector.broadcast %200 : vector<1x32xf32> to vector<8x32xf32>
    %202 = arith.addf %198, %201 : vector<8x32xf32>
    %203 = arith.addf %116, %202 : vector<8x32xf32>
    %cst_81 = arith.constant dense<0.000000e+00> : vector<8xf32>
    %204 = vector.multi_reduction <add>, %203, %cst_81 [1] : vector<8x32xf32> to vector<8xf32>
    %205 = vector.shape_cast %204 : vector<8xf32> to vector<8x1xf32>
    %cst_82 = arith.constant 3.200000e+01 : f32
    %206 = vector.broadcast %cst_82 : f32 to vector<8x1xf32>
    %207 = arith.divf %205, %206 : vector<8x1xf32>
    %208 = vector.broadcast %207 : vector<8x1xf32> to vector<8x32xf32>
    %209 = arith.subf %203, %208 : vector<8x32xf32>
    %210 = arith.mulf %209, %209 : vector<8x32xf32>
    %cst_83 = arith.constant dense<0.000000e+00> : vector<8xf32>
    %211 = vector.multi_reduction <add>, %210, %cst_83 [1] : vector<8x32xf32> to vector<8xf32>
    %212 = vector.shape_cast %211 : vector<8xf32> to vector<8x1xf32>
    %cst_84 = arith.constant 3.200000e+01 : f32
    %213 = vector.broadcast %cst_84 : f32 to vector<8x1xf32>
    %214 = arith.divf %212, %213 : vector<8x1xf32>
    %215 = vector.broadcast %207 : vector<8x1xf32> to vector<8x32xf32>
    %216 = arith.subf %203, %215 : vector<8x32xf32>
    %cst_85 = arith.constant 9.99999974E-6 : f32
    %217 = vector.broadcast %cst_85 : f32 to vector<8x1xf32>
    %218 = arith.addf %214, %217 : vector<8x1xf32>
    %219 = math.rsqrt %218 : vector<8x1xf32>
    %220 = vector.broadcast %219 : vector<8x1xf32> to vector<8x32xf32>
    %221 = arith.mulf %216, %220 : vector<8x32xf32>
    %c0_86 = arith.constant 0 : index
    %c0_87 = arith.constant 0 : index
    %c0_88 = arith.constant 0 : index
    %222 = vector.load %arg7[%c0_86, %c0_87, %c0_88] : memref<4x1x32xf32, #tpu.memory_space<vmem>>, vector<1x1x32xf32>
    %223 = vector.shape_cast %222 : vector<1x1x32xf32> to vector<1x32xf32>
    %224 = vector.broadcast %223 : vector<1x32xf32> to vector<8x32xf32>
    %225 = arith.mulf %221, %224 : vector<8x32xf32>
    %c0_89 = arith.constant 0 : index
    %c0_90 = arith.constant 0 : index
    %c0_91 = arith.constant 0 : index
    %226 = vector.load %arg8[%c0_89, %c0_90, %c0_91] : memref<4x1x32xf32, #tpu.memory_space<vmem>>, vector<1x1x32xf32>
    %227 = vector.shape_cast %226 : vector<1x1x32xf32> to vector<1x32xf32>
    %228 = vector.broadcast %227 : vector<1x32xf32> to vector<8x32xf32>
    %229 = arith.addf %225, %228 : vector<8x32xf32>
    %c2 = arith.constant 2 : index
    %c0_92 = arith.constant 0 : index
    %c0_93 = arith.constant 0 : index
    %230 = vector.load %arg3[%c2, %c0_92, %c0_93] : memref<3x32x96xf32, #tpu.memory_space<vmem>>, vector<1x32x96xf32>
    %231 = vector.shape_cast %230 : vector<1x32x96xf32> to vector<32x96xf32>
    %c2_94 = arith.constant 2 : index
    %c0_95 = arith.constant 0 : index
    %c0_96 = arith.constant 0 : index
    %232 = vector.load %arg4[%c2_94, %c0_95, %c0_96] : memref<3x1x96xf32, #tpu.memory_space<vmem>>, vector<1x1x96xf32>
    %233 = vector.shape_cast %232 : vector<1x1x96xf32> to vector<1x96xf32>
    %234 = vector.extract_strided_slice %231 {offsets = [0, 0], sizes = [32, 32], strides = [1, 1]} : vector<32x96xf32> to vector<32x32xf32>
    %cst_97 = arith.constant dense<0.000000e+00> : vector<8x32xf32>
    %235 = tpu.matmul %229, %234, %cst_97 {dimension_numbers = #tpu.dot_dimension_numbers<[1], [0], [0], [1], [0, 0, 1, 1], [], []>} : vector<8x32xf32>, vector<32x32xf32>, vector<8x32xf32> -> vector<8x32xf32>
    %236 = vector.extract_strided_slice %233 {offsets = [0, 0], sizes = [1, 32], strides = [1, 1]} : vector<1x96xf32> to vector<1x32xf32>
    %237 = vector.broadcast %236 : vector<1x32xf32> to vector<8x32xf32>
    %238 = arith.addf %235, %237 : vector<8x32xf32>
    %239 = vector.extract_strided_slice %231 {offsets = [0, 32], sizes = [32, 64], strides = [1, 1]} : vector<32x96xf32> to vector<32x64xf32>
    %cst_98 = arith.constant dense<0.000000e+00> : vector<8x64xf32>
    %240 = tpu.matmul %3, %239, %cst_98 {dimension_numbers = #tpu.dot_dimension_numbers<[1], [0], [0], [1], [0, 0, 1, 1], [], []>} : vector<8x32xf32>, vector<32x64xf32>, vector<8x64xf32> -> vector<8x64xf32>
    %241 = vector.extract_strided_slice %233 {offsets = [0, 32], sizes = [1, 64], strides = [1, 1]} : vector<1x96xf32> to vector<1x64xf32>
    %242 = vector.broadcast %241 : vector<1x64xf32> to vector<8x64xf32>
    %243 = arith.addf %240, %242 : vector<8x64xf32>
    %244 = vector.extract_strided_slice %243 {offsets = [0, 0], sizes = [8, 32], strides = [1, 1]} : vector<8x64xf32> to vector<8x32xf32>
    %245 = vector.extract_strided_slice %243 {offsets = [0, 32], sizes = [8, 32], strides = [1, 1]} : vector<8x64xf32> to vector<8x32xf32>
    %246 = vector.extract_strided_slice %238 {offsets = [0, 0], sizes = [8, 8], strides = [1, 1]} : vector<8x32xf32> to vector<8x8xf32>
    %247 = vector.extract_strided_slice %244 {offsets = [0, 0], sizes = [8, 8], strides = [1, 1]} : vector<8x32xf32> to vector<8x8xf32>
    %248 = vector.extract_strided_slice %245 {offsets = [0, 0], sizes = [8, 8], strides = [1, 1]} : vector<8x32xf32> to vector<8x8xf32>
    %cst_99 = arith.constant dense<0.000000e+00> : vector<8x8xf32>
    %249 = tpu.matmul %246, %247, %cst_99 {dimension_numbers = #tpu.dot_dimension_numbers<[1], [1], [0], [0], [0, 0, 1, 0], [], []>} : vector<8x8xf32>, vector<8x8xf32>, vector<8x8xf32> -> vector<8x8xf32>
    %cst_100 = arith.constant 0.353553385 : f32
    %250 = vector.broadcast %cst_100 : f32 to vector<8x8xf32>
    %251 = arith.mulf %249, %250 : vector<8x8xf32>
    %cst_101 = arith.constant dense<0xFF800000> : vector<8xf32>
    %252 = vector.multi_reduction <maximumf>, %251, %cst_101 [1] : vector<8x8xf32> to vector<8xf32>
    %253 = vector.shape_cast %252 : vector<8xf32> to vector<8x1xf32>
    %254 = vector.broadcast %253 : vector<8x1xf32> to vector<8x8xf32>
    %255 = arith.subf %251, %254 : vector<8x8xf32>
    %256 = math.exp %255 : vector<8x8xf32>
    %cst_102 = arith.constant dense<0.000000e+00> : vector<8xf32>
    %257 = vector.multi_reduction <add>, %256, %cst_102 [1] : vector<8x8xf32> to vector<8xf32>
    %258 = vector.shape_cast %257 : vector<8xf32> to vector<8x1xf32>
    %259 = tpu.reciprocal %258 {approx = true} : vector<8x1xf32> -> vector<8x1xf32>
    %260 = vector.broadcast %259 : vector<8x1xf32> to vector<8x8xf32>
    %261 = arith.mulf %256, %260 : vector<8x8xf32>
    %cst_103 = arith.constant dense<0.000000e+00> : vector<8x8xf32>
    %262 = tpu.matmul %261, %248, %cst_103 {dimension_numbers = #tpu.dot_dimension_numbers<[1], [0], [0], [1], [0, 0, 1, 1], [], []>} : vector<8x8xf32>, vector<8x8xf32>, vector<8x8xf32> -> vector<8x8xf32>
    %263 = vector.extract_strided_slice %238 {offsets = [0, 8], sizes = [8, 8], strides = [1, 1]} : vector<8x32xf32> to vector<8x8xf32>
    %264 = vector.extract_strided_slice %244 {offsets = [0, 8], sizes = [8, 8], strides = [1, 1]} : vector<8x32xf32> to vector<8x8xf32>
    %265 = vector.extract_strided_slice %245 {offsets = [0, 8], sizes = [8, 8], strides = [1, 1]} : vector<8x32xf32> to vector<8x8xf32>
    %cst_104 = arith.constant dense<0.000000e+00> : vector<8x8xf32>
    %266 = tpu.matmul %263, %264, %cst_104 {dimension_numbers = #tpu.dot_dimension_numbers<[1], [1], [0], [0], [0, 0, 1, 0], [], []>} : vector<8x8xf32>, vector<8x8xf32>, vector<8x8xf32> -> vector<8x8xf32>
    %cst_105 = arith.constant 0.353553385 : f32
    %267 = vector.broadcast %cst_105 : f32 to vector<8x8xf32>
    %268 = arith.mulf %266, %267 : vector<8x8xf32>
    %cst_106 = arith.constant dense<0xFF800000> : vector<8xf32>
    %269 = vector.multi_reduction <maximumf>, %268, %cst_106 [1] : vector<8x8xf32> to vector<8xf32>
    %270 = vector.shape_cast %269 : vector<8xf32> to vector<8x1xf32>
    %271 = vector.broadcast %270 : vector<8x1xf32> to vector<8x8xf32>
    %272 = arith.subf %268, %271 : vector<8x8xf32>
    %273 = math.exp %272 : vector<8x8xf32>
    %cst_107 = arith.constant dense<0.000000e+00> : vector<8xf32>
    %274 = vector.multi_reduction <add>, %273, %cst_107 [1] : vector<8x8xf32> to vector<8xf32>
    %275 = vector.shape_cast %274 : vector<8xf32> to vector<8x1xf32>
    %276 = tpu.reciprocal %275 {approx = true} : vector<8x1xf32> -> vector<8x1xf32>
    %277 = vector.broadcast %276 : vector<8x1xf32> to vector<8x8xf32>
    %278 = arith.mulf %273, %277 : vector<8x8xf32>
    %cst_108 = arith.constant dense<0.000000e+00> : vector<8x8xf32>
    %279 = tpu.matmul %278, %265, %cst_108 {dimension_numbers = #tpu.dot_dimension_numbers<[1], [0], [0], [1], [0, 0, 1, 1], [], []>} : vector<8x8xf32>, vector<8x8xf32>, vector<8x8xf32> -> vector<8x8xf32>
    %280 = vector.extract_strided_slice %238 {offsets = [0, 16], sizes = [8, 8], strides = [1, 1]} : vector<8x32xf32> to vector<8x8xf32>
    %281 = vector.extract_strided_slice %244 {offsets = [0, 16], sizes = [8, 8], strides = [1, 1]} : vector<8x32xf32> to vector<8x8xf32>
    %282 = vector.extract_strided_slice %245 {offsets = [0, 16], sizes = [8, 8], strides = [1, 1]} : vector<8x32xf32> to vector<8x8xf32>
    %cst_109 = arith.constant dense<0.000000e+00> : vector<8x8xf32>
    %283 = tpu.matmul %280, %281, %cst_109 {dimension_numbers = #tpu.dot_dimension_numbers<[1], [1], [0], [0], [0, 0, 1, 0], [], []>} : vector<8x8xf32>, vector<8x8xf32>, vector<8x8xf32> -> vector<8x8xf32>
    %cst_110 = arith.constant 0.353553385 : f32
    %284 = vector.broadcast %cst_110 : f32 to vector<8x8xf32>
    %285 = arith.mulf %283, %284 : vector<8x8xf32>
    %cst_111 = arith.constant dense<0xFF800000> : vector<8xf32>
    %286 = vector.multi_reduction <maximumf>, %285, %cst_111 [1] : vector<8x8xf32> to vector<8xf32>
    %287 = vector.shape_cast %286 : vector<8xf32> to vector<8x1xf32>
    %288 = vector.broadcast %287 : vector<8x1xf32> to vector<8x8xf32>
    %289 = arith.subf %285, %288 : vector<8x8xf32>
    %290 = math.exp %289 : vector<8x8xf32>
    %cst_112 = arith.constant dense<0.000000e+00> : vector<8xf32>
    %291 = vector.multi_reduction <add>, %290, %cst_112 [1] : vector<8x8xf32> to vector<8xf32>
    %292 = vector.shape_cast %291 : vector<8xf32> to vector<8x1xf32>
    %293 = tpu.reciprocal %292 {approx = true} : vector<8x1xf32> -> vector<8x1xf32>
    %294 = vector.broadcast %293 : vector<8x1xf32> to vector<8x8xf32>
    %295 = arith.mulf %290, %294 : vector<8x8xf32>
    %cst_113 = arith.constant dense<0.000000e+00> : vector<8x8xf32>
    %296 = tpu.matmul %295, %282, %cst_113 {dimension_numbers = #tpu.dot_dimension_numbers<[1], [0], [0], [1], [0, 0, 1, 1], [], []>} : vector<8x8xf32>, vector<8x8xf32>, vector<8x8xf32> -> vector<8x8xf32>
    %297 = vector.extract_strided_slice %238 {offsets = [0, 24], sizes = [8, 8], strides = [1, 1]} : vector<8x32xf32> to vector<8x8xf32>
    %298 = vector.extract_strided_slice %244 {offsets = [0, 24], sizes = [8, 8], strides = [1, 1]} : vector<8x32xf32> to vector<8x8xf32>
    %299 = vector.extract_strided_slice %245 {offsets = [0, 24], sizes = [8, 8], strides = [1, 1]} : vector<8x32xf32> to vector<8x8xf32>
    %cst_114 = arith.constant dense<0.000000e+00> : vector<8x8xf32>
    %300 = tpu.matmul %297, %298, %cst_114 {dimension_numbers = #tpu.dot_dimension_numbers<[1], [1], [0], [0], [0, 0, 1, 0], [], []>} : vector<8x8xf32>, vector<8x8xf32>, vector<8x8xf32> -> vector<8x8xf32>
    %cst_115 = arith.constant 0.353553385 : f32
    %301 = vector.broadcast %cst_115 : f32 to vector<8x8xf32>
    %302 = arith.mulf %300, %301 : vector<8x8xf32>
    %cst_116 = arith.constant dense<0xFF800000> : vector<8xf32>
    %303 = vector.multi_reduction <maximumf>, %302, %cst_116 [1] : vector<8x8xf32> to vector<8xf32>
    %304 = vector.shape_cast %303 : vector<8xf32> to vector<8x1xf32>
    %305 = vector.broadcast %304 : vector<8x1xf32> to vector<8x8xf32>
    %306 = arith.subf %302, %305 : vector<8x8xf32>
    %307 = math.exp %306 : vector<8x8xf32>
    %cst_117 = arith.constant dense<0.000000e+00> : vector<8xf32>
    %308 = vector.multi_reduction <add>, %307, %cst_117 [1] : vector<8x8xf32> to vector<8xf32>
    %309 = vector.shape_cast %308 : vector<8xf32> to vector<8x1xf32>
    %310 = tpu.reciprocal %309 {approx = true} : vector<8x1xf32> -> vector<8x1xf32>
    %311 = vector.broadcast %310 : vector<8x1xf32> to vector<8x8xf32>
    %312 = arith.mulf %307, %311 : vector<8x8xf32>
    %cst_118 = arith.constant dense<0.000000e+00> : vector<8x8xf32>
    %313 = tpu.matmul %312, %299, %cst_118 {dimension_numbers = #tpu.dot_dimension_numbers<[1], [0], [0], [1], [0, 0, 1, 1], [], []>} : vector<8x8xf32>, vector<8x8xf32>, vector<8x8xf32> -> vector<8x8xf32>
    %314 = tpu.concatenate %262, %279, %296, %313 in 1 : vector<8x8xf32>, vector<8x8xf32>, vector<8x8xf32>, vector<8x8xf32> -> vector<8x32xf32>
    %c2_119 = arith.constant 2 : index
    %c0_120 = arith.constant 0 : index
    %c0_121 = arith.constant 0 : index
    %315 = vector.load %arg5[%c2_119, %c0_120, %c0_121] : memref<3x32x32xf32, #tpu.memory_space<vmem>>, vector<1x32x32xf32>
    %316 = vector.shape_cast %315 : vector<1x32x32xf32> to vector<32x32xf32>
    %cst_122 = arith.constant dense<0.000000e+00> : vector<8x32xf32>
    %317 = tpu.matmul %314, %316, %cst_122 {dimension_numbers = #tpu.dot_dimension_numbers<[1], [0], [0], [1], [0, 0, 1, 1], [], []>} : vector<8x32xf32>, vector<32x32xf32>, vector<8x32xf32> -> vector<8x32xf32>
    %c2_123 = arith.constant 2 : index
    %c0_124 = arith.constant 0 : index
    %c0_125 = arith.constant 0 : index
    %318 = vector.load %arg6[%c2_123, %c0_124, %c0_125] : memref<3x1x32xf32, #tpu.memory_space<vmem>>, vector<1x1x32xf32>
    %319 = vector.shape_cast %318 : vector<1x1x32xf32> to vector<1x32xf32>
    %320 = vector.broadcast %319 : vector<1x32xf32> to vector<8x32xf32>
    %321 = arith.addf %317, %320 : vector<8x32xf32>
    %322 = arith.addf %229, %321 : vector<8x32xf32>
    %cst_126 = arith.constant dense<0.000000e+00> : vector<8xf32>
    %323 = vector.multi_reduction <add>, %322, %cst_126 [1] : vector<8x32xf32> to vector<8xf32>
    %324 = vector.shape_cast %323 : vector<8xf32> to vector<8x1xf32>
    %cst_127 = arith.constant 3.200000e+01 : f32
    %325 = vector.broadcast %cst_127 : f32 to vector<8x1xf32>
    %326 = arith.divf %324, %325 : vector<8x1xf32>
    %327 = vector.broadcast %326 : vector<8x1xf32> to vector<8x32xf32>
    %328 = arith.subf %322, %327 : vector<8x32xf32>
    %329 = arith.mulf %328, %328 : vector<8x32xf32>
    %cst_128 = arith.constant dense<0.000000e+00> : vector<8xf32>
    %330 = vector.multi_reduction <add>, %329, %cst_128 [1] : vector<8x32xf32> to vector<8xf32>
    %331 = vector.shape_cast %330 : vector<8xf32> to vector<8x1xf32>
    %cst_129 = arith.constant 3.200000e+01 : f32
    %332 = vector.broadcast %cst_129 : f32 to vector<8x1xf32>
    %333 = arith.divf %331, %332 : vector<8x1xf32>
    %334 = vector.broadcast %326 : vector<8x1xf32> to vector<8x32xf32>
    %335 = arith.subf %322, %334 : vector<8x32xf32>
    %cst_130 = arith.constant 9.99999974E-6 : f32
    %336 = vector.broadcast %cst_130 : f32 to vector<8x1xf32>
    %337 = arith.addf %333, %336 : vector<8x1xf32>
    %338 = math.rsqrt %337 : vector<8x1xf32>
    %339 = vector.broadcast %338 : vector<8x1xf32> to vector<8x32xf32>
    %340 = arith.mulf %335, %339 : vector<8x32xf32>
    %c1_131 = arith.constant 1 : index
    %c0_132 = arith.constant 0 : index
    %c0_133 = arith.constant 0 : index
    %341 = vector.load %arg7[%c1_131, %c0_132, %c0_133] : memref<4x1x32xf32, #tpu.memory_space<vmem>>, vector<1x1x32xf32>
    %342 = vector.shape_cast %341 : vector<1x1x32xf32> to vector<1x32xf32>
    %343 = vector.broadcast %342 : vector<1x32xf32> to vector<8x32xf32>
    %344 = arith.mulf %340, %343 : vector<8x32xf32>
    %c1_134 = arith.constant 1 : index
    %c0_135 = arith.constant 0 : index
    %c0_136 = arith.constant 0 : index
    %345 = vector.load %arg8[%c1_134, %c0_135, %c0_136] : memref<4x1x32xf32, #tpu.memory_space<vmem>>, vector<1x1x32xf32>
    %346 = vector.shape_cast %345 : vector<1x1x32xf32> to vector<1x32xf32>
    %347 = vector.broadcast %346 : vector<1x32xf32> to vector<8x32xf32>
    %348 = arith.addf %344, %347 : vector<8x32xf32>
    %c0_137 = arith.constant 0 : index
    %c0_138 = arith.constant 0 : index
    %349 = vector.load %arg9[%c0_137, %c0_138] : memref<32x64xf32, #tpu.memory_space<vmem>>, vector<32x64xf32>
    %cst_139 = arith.constant dense<0.000000e+00> : vector<8x64xf32>
    %350 = tpu.matmul %348, %349, %cst_139 {dimension_numbers = #tpu.dot_dimension_numbers<[1], [0], [0], [1], [0, 0, 1, 1], [], []>} : vector<8x32xf32>, vector<32x64xf32>, vector<8x64xf32> -> vector<8x64xf32>
    %c0_140 = arith.constant 0 : index
    %c0_141 = arith.constant 0 : index
    %351 = vector.load %arg10[%c0_140, %c0_141] : memref<1x64xf32, #tpu.memory_space<vmem>>, vector<1x64xf32>
    %352 = vector.broadcast %351 : vector<1x64xf32> to vector<8x64xf32>
    %353 = arith.addf %350, %352 : vector<8x64xf32>
    %cst_142 = arith.constant 0.000000e+00 : f32
    %354 = vector.broadcast %cst_142 : f32 to vector<8x64xf32>
    %355 = arith.maximumf %353, %354 : vector<8x64xf32>
    %c0_143 = arith.constant 0 : index
    %c0_144 = arith.constant 0 : index
    %356 = vector.load %arg11[%c0_143, %c0_144] : memref<64x32xf32, #tpu.memory_space<vmem>>, vector<64x32xf32>
    %cst_145 = arith.constant dense<0.000000e+00> : vector<8x32xf32>
    %357 = tpu.matmul %355, %356, %cst_145 {dimension_numbers = #tpu.dot_dimension_numbers<[1], [0], [0], [1], [0, 0, 1, 1], [], []>} : vector<8x64xf32>, vector<64x32xf32>, vector<8x32xf32> -> vector<8x32xf32>
    %c0_146 = arith.constant 0 : index
    %c0_147 = arith.constant 0 : index
    %358 = vector.load %arg12[%c0_146, %c0_147] : memref<1x32xf32, #tpu.memory_space<vmem>>, vector<1x32xf32>
    %359 = vector.broadcast %358 : vector<1x32xf32> to vector<8x32xf32>
    %360 = arith.addf %357, %359 : vector<8x32xf32>
    %361 = arith.addf %348, %360 : vector<8x32xf32>
    %cst_148 = arith.constant dense<0.000000e+00> : vector<8xf32>
    %362 = vector.multi_reduction <add>, %361, %cst_148 [1] : vector<8x32xf32> to vector<8xf32>
    %363 = vector.shape_cast %362 : vector<8xf32> to vector<8x1xf32>
    %cst_149 = arith.constant 3.200000e+01 : f32
    %364 = vector.broadcast %cst_149 : f32 to vector<8x1xf32>
    %365 = arith.divf %363, %364 : vector<8x1xf32>
    %366 = vector.broadcast %365 : vector<8x1xf32> to vector<8x32xf32>
    %367 = arith.subf %361, %366 : vector<8x32xf32>
    %368 = arith.mulf %367, %367 : vector<8x32xf32>
    %cst_150 = arith.constant dense<0.000000e+00> : vector<8xf32>
    %369 = vector.multi_reduction <add>, %368, %cst_150 [1] : vector<8x32xf32> to vector<8xf32>
    %370 = vector.shape_cast %369 : vector<8xf32> to vector<8x1xf32>
    %cst_151 = arith.constant 3.200000e+01 : f32
    %371 = vector.broadcast %cst_151 : f32 to vector<8x1xf32>
    %372 = arith.divf %370, %371 : vector<8x1xf32>
    %373 = vector.broadcast %365 : vector<8x1xf32> to vector<8x32xf32>
    %374 = arith.subf %361, %373 : vector<8x32xf32>
    %cst_152 = arith.constant 9.99999974E-6 : f32
    %375 = vector.broadcast %cst_152 : f32 to vector<8x1xf32>
    %376 = arith.addf %372, %375 : vector<8x1xf32>
    %377 = math.rsqrt %376 : vector<8x1xf32>
    %378 = vector.broadcast %377 : vector<8x1xf32> to vector<8x32xf32>
    %379 = arith.mulf %374, %378 : vector<8x32xf32>
    %c2_153 = arith.constant 2 : index
    %c0_154 = arith.constant 0 : index
    %c0_155 = arith.constant 0 : index
    %380 = vector.load %arg7[%c2_153, %c0_154, %c0_155] : memref<4x1x32xf32, #tpu.memory_space<vmem>>, vector<1x1x32xf32>
    %381 = vector.shape_cast %380 : vector<1x1x32xf32> to vector<1x32xf32>
    %382 = vector.broadcast %381 : vector<1x32xf32> to vector<8x32xf32>
    %383 = arith.mulf %379, %382 : vector<8x32xf32>
    %c2_156 = arith.constant 2 : index
    %c0_157 = arith.constant 0 : index
    %c0_158 = arith.constant 0 : index
    %384 = vector.load %arg8[%c2_156, %c0_157, %c0_158] : memref<4x1x32xf32, #tpu.memory_space<vmem>>, vector<1x1x32xf32>
    %385 = vector.shape_cast %384 : vector<1x1x32xf32> to vector<1x32xf32>
    %386 = vector.broadcast %385 : vector<1x32xf32> to vector<8x32xf32>
    %387 = arith.addf %383, %386 : vector<8x32xf32>
    %c0_159 = arith.constant 0 : index
    %c0_160 = arith.constant 0 : index
    %c0_161 = arith.constant 0 : index
    %388 = vector.load %arg13[%c0_159, %c0_160, %c0_161] : memref<1x8x32xf32, #tpu.memory_space<vmem>>, vector<1x8x32xf32>
    %389 = vector.shape_cast %388 : vector<1x8x32xf32> to vector<8x32xf32>
    %390 = vector.shape_cast %387 : vector<8x32xf32> to vector<1x8x32xf32>
    tpu.vector_store %arg13[%c0_159, %c0_160, %c0_161], %390 {strides = array<i32>} : memref<1x8x32xf32, #tpu.memory_space<vmem>>, vector<1x8x32xf32>,
    return
  }
  func.func @transform_0(%arg0: i32) -> (i32, i32, i32) {
    %c0_i32 = arith.constant 0 : i32
    %c0_i32_0 = arith.constant 0 : i32
    %c0_i32_1 = arith.constant 0 : i32
    return %arg0, %c0_i32, %c0_i32_0 : i32, i32, i32
  }
  func.func @transform_1(%arg0: i32) -> (i32, i32, i32) {
    %c0_i32 = arith.constant 0 : i32
    %c0_i32_0 = arith.constant 0 : i32
    %c0_i32_1 = arith.constant 0 : i32
    return %arg0, %c0_i32, %c0_i32_0 : i32, i32, i32
  }
  func.func @transform_2(%arg0: i32) -> (i32, i32, i32) {
    %c0_i32 = arith.constant 0 : i32
    %c0_i32_0 = arith.constant 0 : i32
    %c0_i32_1 = arith.constant 0 : i32
    %c0_i32_2 = arith.constant 0 : i32
    return %c0_i32, %c0_i32_0, %c0_i32_1 : i32, i32, i32
  }
  func.func @transform_3(%arg0: i32) -> (i32, i32, i32) {
    %c0_i32 = arith.constant 0 : i32
    %c0_i32_0 = arith.constant 0 : i32
    %c0_i32_1 = arith.constant 0 : i32
    %c0_i32_2 = arith.constant 0 : i32
    return %c0_i32, %c0_i32_0, %c0_i32_1 : i32, i32, i32
  }
  func.func @transform_4(%arg0: i32) -> (i32, i32, i32) {
    %c0_i32 = arith.constant 0 : i32
    %c0_i32_0 = arith.constant 0 : i32
    %c0_i32_1 = arith.constant 0 : i32
    %c0_i32_2 = arith.constant 0 : i32
    return %c0_i32, %c0_i32_0, %c0_i32_1 : i32, i32, i32
  }
  func.func @transform_5(%arg0: i32) -> (i32, i32, i32) {
    %c0_i32 = arith.constant 0 : i32
    %c0_i32_0 = arith.constant 0 : i32
    %c0_i32_1 = arith.constant 0 : i32
    %c0_i32_2 = arith.constant 0 : i32
    return %c0_i32, %c0_i32_0, %c0_i32_1 : i32, i32, i32
  }
  func.func @transform_6(%arg0: i32) -> (i32, i32, i32) {
    %c0_i32 = arith.constant 0 : i32
    %c0_i32_0 = arith.constant 0 : i32
    %c0_i32_1 = arith.constant 0 : i32
    %c0_i32_2 = arith.constant 0 : i32
    return %c0_i32, %c0_i32_0, %c0_i32_1 : i32, i32, i32
  }
  func.func @transform_7(%arg0: i32) -> (i32, i32, i32) {
    %c0_i32 = arith.constant 0 : i32
    %c0_i32_0 = arith.constant 0 : i32
    %c0_i32_1 = arith.constant 0 : i32
    %c0_i32_2 = arith.constant 0 : i32
    return %c0_i32, %c0_i32_0, %c0_i32_1 : i32, i32, i32
  }
  func.func @transform_8(%arg0: i32) -> (i32, i32) {
    %c0_i32 = arith.constant 0 : i32
    %c0_i32_0 = arith.constant 0 : i32
    %c0_i32_1 = arith.constant 0 : i32
    return %c0_i32, %c0_i32_0 : i32, i32
  }
  func.func @transform_9(%arg0: i32) -> (i32, i32) {
    %c0_i32 = arith.constant 0 : i32
    %c0_i32_0 = arith.constant 0 : i32
    %c0_i32_1 = arith.constant 0 : i32
    return %c0_i32, %c0_i32_0 : i32, i32
  }
  func.func @transform_10(%arg0: i32) -> (i32, i32) {
    %c0_i32 = arith.constant 0 : i32
    %c0_i32_0 = arith.constant 0 : i32
    %c0_i32_1 = arith.constant 0 : i32
    return %c0_i32, %c0_i32_0 : i32, i32
  }
  func.func @transform_11(%arg0: i32) -> (i32, i32) {
    %c0_i32 = arith.constant 0 : i32
    %c0_i32_0 = arith.constant 0 : i32
    %c0_i32_1 = arith.constant 0 : i32
    return %c0_i32, %c0_i32_0 : i32, i32
  }
  func.func @transform_12(%arg0: i32) -> (i32, i32, i32) {
    %c0_i32 = arith.constant 0 : i32
    %c0_i32_0 = arith.constant 0 : i32
    %c0_i32_1 = arith.constant 0 : i32
    return %arg0, %c0_i32, %c0_i32_0 : i32, i32, i32
  }
}

</mosaic_0001>

<bundles_post_ra>
// kernel: cdg_decoder_layer.1
= control target key start
LH: loop header
LB: loop body
LE: loop exit
PB: predicated region body
PF: predicated region fallthrough
CT: control target
= control target key end

     0   :  { %s5019_s0 = inlined_call_operand.vmem [shape: f32[2,8,32], index: 0, kind: input, shape index: {}]   ;;  %s5020_s1 = inlined_call_operand.vmem [shape: f32[2,8,32], index: 1, kind: input, shape index: {}]   ;;  %s5021_s2 = inlined_call_operand.vmem [shape: f32[3,32,96], index: 2, kind: input, shape index: {}]   ;;  %s5022_s3 = inlined_call_operand.hbm [shape: f32[3,1,96], index: 3, kind: input, shape index: {}]   ;;  %s5023_s4 = inlined_call_operand.vmem [shape: f32[3,32,32], index: 4, kind: input, shape index: {}]   ;;  %s5024_s5 = inlined_call_operand.hbm [shape: f32[3,1,32], index: 5, kind: input, shape index: {}]   ;;  %s5025_s6 = inlined_call_operand.hbm [shape: f32[4,1,32], index: 6, kind: input, shape index: {}]   ;;  %s5026_s7 = inlined_call_operand.hbm [shape: f32[4,1,32], index: 7, kind: input, shape index: {}]   ;;  %s5027_s8 = inlined_call_operand.hbm [shape: f32[32,64], index: 8, kind: input, shape index: {}]   ;;  %s5028_s9 = inlined_call_operand.vmem [shape: f32[1,64], index: 9, kind: input, shape index: {}]   ;;  %s5029_s10 = inlined_call_operand.vmem [shape: f32[64,32], index: 10, kind: input, shape index: {}]   ;;  %s5030_s11 = inlined_call_operand.vmem [shape: f32[1,32], index: 11, kind: input, shape index: {}]   ;;  %s5031_s12 = inlined_call_operand.vmem [shape: f32[2,8,32], index: 12, kind: output, shape index: {}]  }
   0x1   :  { %5042 = sst [smem:[#allocation14_spill]] %s5031_s12 }
   0x2   :  { %17 = vsyncpa [#allocation3], 0 }
   0x3   :  { %18 = vsyncpa [#allocation5], 0 }
   0x4   :  { %19 = vsyncpa [#allocation8], 0  ;;  %s4437_s21 = smov 0  }
   0x5 LB: > { %5043 = sst [smem:[#allocation13_spill]] %s4344_s21  ;;  %s4443_s22 = sadd.s32 4294967295, %s4344_s21   ;;  %s4344_s21 = sphi %s4437_s21, %s25_s21  }
   0x6   : > { %p3561_p0 = scmp.ge.s32.totalorder %s4344_s21, 1  ;;  %p318_p1 = scmp.lt.s32.totalorder %s4344_s21, 3 }
   0x7   : > { %p5033_p2 = scmp.eq.s32.totalorder %s4443_s22, 0  ;;  %s4346_s24 = smov [#allocation4]  }
   0x8   : > { %p4448_p3 = pnand %p3561_p0, %p318_p1  ;;  %s349_s25 = sshll.u32 %s4346_s24, 4  ;;  %s4452_s25 = int_to_ptr.vmem [resolvable:$true] %s349_s25 }
   0x9   : > { %s4347_s26 = smov [#allocation7]   ;;  %s4348_s29 = smov [#allocation2]  }
   0xa   : > { %s5044_s23 = scalar_select %p4448_p3, 1, 0 }
   0xb   : > { %p4060_p4 = pneg %p4448_p3  ;;  %s375_s27 = sshll.u32 %s4347_s26, 4  ;;  %s4456_s27 = int_to_ptr.vmem [resolvable:$true] %s375_s27 }
   0xc   : > { %s333_s30 = sshll.u32 %s4348_s29, 4  ;;  %s4349_s13 = smov [#allocation6]   ;;  %s4464_s30 = int_to_ptr.vmem [resolvable:$true] %s333_s30 }
   0xd   : > { %p4460_p5 = pnand %p5033_p2, %p4060_p4  ;;  %s4466_s14 = sshll.u32 %s4349_s13, 4  ;;  %s363_s14 = int_to_ptr.vmem [resolvable:$true] %s4466_s14 }
   0xe   : > { %s4186_s17 = scalar_lea.hbm %s5024_s5, 48 }
   0xf   : > { %p4187_p6 = scmp.ne.s32.totalorder %s5024_s5, %s4186_s17  ;;  %p4476_p7 = pneg %p4460_p5 }
  0x10   : > { %p4193_p10 = scmp.lt.u32.totalorder %s4186_s17, %s5024_s5 }
  0x11   : > { %p4189_p8 = pnand %p4476_p7, %p4187_p6 }
  0x13   : > { %p4190_p9 = pneg %p4189_p8 }
  0x15   : > { %p4195_p11 = pnand %p4193_p10, %p4190_p9 }
  0x17   : > { %4198 = shalt.err (!%p4195_p11)
}
  0x18   : > { %s4199_s29 = scalar_lea.vmem %s4452_s25, 48  ;;  %s4206_s13 = scalar_lea.vmem %s4452_s25, 64 }
  0x19   : > { %p4200_p12 = scmp.ne.s32.totalorder %s4452_s25, %s4199_s29  ;;  %p4207_p1 = scmp.lt.s32.totalorder %s4452_s25, %s4452_s25 }
  0x1a   : > { %p4208_p4 = scmp.lt.s32.totalorder %s4206_s13, %s4199_s29 }
  0x1b   : > { %p4202_p13 = pnand %p4200_p12, %p4476_p7 }
  0x1c   : > { %p4209_p6 = por %p4208_p4, %p4207_p1 }
  0x1d   : > { %p4203_p0 = pneg %p4202_p13 }
  0x1f   : > { %p4210_p8 = pnand %p4209_p6, %p4203_p0 }
  0x21   : > { %4213 = shalt.err (!%p4210_p8)
}
  0x22   : > { %s4350_s15 = smov 16   ;;  %s4351_s16 = smov 1  }
  0x23   : > { %4066 = dma.hbm_to_vmem [thread:$0]  (!%p4460_p5), %s5024_s5, 48, %s4452_s25, [#allocation5], %s4350_s15, %s4350_s15, %s4351_s16  }
  0x24   : > { %s4214_s26 = scalar_lea.hbm %s5026_s7, 64 }
  0x25   : > { %p4215_p9 = scmp.ne.s32.totalorder %s5026_s7, %s4214_s26  ;;  %p4221_p12 = scmp.lt.u32.totalorder %s4214_s26, %s5026_s7 }
  0x27   : > { %p4217_p10 = pnand %p4215_p9, %p4476_p7 }
  0x29   : > { %p4218_p11 = pneg %p4217_p10 }
  0x2b   : > { %p4223_p13 = pnand %p4221_p12, %p4218_p11 }
  0x2d   : > { %4226 = shalt.err (!%p4223_p13)
}
  0x2e   : > { %s4227_s25 = scalar_lea.vmem %s4456_s27, 64  ;;  %p4235_p6 = scmp.lt.s32.totalorder %s4456_s27, %s4456_s27 }
  0x2f   : > { %p4228_p0 = scmp.ne.s32.totalorder %s4456_s27, %s4227_s25  ;;  %p4236_p8 = scmp.lt.s32.totalorder %s4227_s25, %s4227_s25 }
  0x31   : > { %p4230_p1 = pnand %p4228_p0, %p4476_p7  ;;  %p4237_p9 = por %p4236_p8, %p4235_p6 }
  0x33   : > { %p4231_p4 = pneg %p4230_p1 }
  0x35   : > { %p4238_p10 = pnand %p4237_p9, %p4231_p4 }
  0x37   : > { %4241 = shalt.err (!%p4238_p10)
}
  0x38   : > { %4072 = dma.hbm_to_vmem [thread:$0]  (!%p4460_p5), %s5026_s7, 64, %s4456_s27, [#allocation8], %s4350_s15, %s4350_s15, %s4351_s16  }
  0x39   : > { %s4242_s19 = scalar_lea.hbm %s5022_s3, 48 }
  0x3a   : > { %p4243_p11 = scmp.ne.s32.totalorder %s5022_s3, %s4242_s19  ;;  %p4249_p0 = scmp.lt.u32.totalorder %s4242_s19, %s5022_s3 }
  0x3c   : > { %p4245_p12 = pnand %p4243_p11, %p4476_p7 }
  0x3e   : > { %p4246_p13 = pneg %p4245_p12 }
  0x40   : > { %p4251_p1 = pnand %p4249_p0, %p4246_p13 }
  0x42   : > { %4254 = shalt.err (!%p4251_p1)
}
  0x43   : > { %s4255_s27 = scalar_lea.vmem %s4464_s30, 48  ;;  %s4262_s25 = scalar_lea.vmem %s4464_s30, 64 }
  0x44   : > { %p4256_p4 = scmp.ne.s32.totalorder %s4464_s30, %s4255_s27  ;;  %p4263_p9 = scmp.lt.s32.totalorder %s4464_s30, %s4464_s30 }
  0x45   : > { %p4264_p10 = scmp.lt.s32.totalorder %s4262_s25, %s4255_s27 }
  0x46   : > { %p4258_p6 = pnand %p4256_p4, %p4476_p7 }
  0x47   : > { %p4265_p11 = por %p4264_p10, %p4263_p9 }
  0x48   : > { %p4259_p8 = pneg %p4258_p6 }
  0x4a   : > { %p4266_p12 = pnand %p4265_p11, %p4259_p8 }
  0x4c   : > { %4269 = shalt.err (!%p4266_p12)
}
  0x4d   : > { %4063 = dma.hbm_to_vmem [thread:$0]  (!%p4460_p5), %s5022_s3, 48, %s4464_s30, [#allocation3], %s4350_s15, %s4350_s15, %s4351_s16  }
  0x4e   : > { %s4270_s19 = scalar_lea.hbm %s5025_s6, 64 }
  0x4f   : > { %p4271_p13 = scmp.ne.s32.totalorder %s5025_s6, %s4270_s19  ;;  %p4277_p4 = scmp.lt.u32.totalorder %s4270_s19, %s5025_s6 }
  0x51   : > { %p4273_p0 = pnand %p4271_p13, %p4476_p7 }
  0x53   : > { %p4274_p1 = pneg %p4273_p0 }
  0x55   : > { %p4279_p6 = pnand %p4277_p4, %p4274_p1 }
  0x57   : > { %4282 = shalt.err (!%p4279_p6)
}
  0x58   : > { %s4283_s27 = scalar_lea.vmem %s363_s14, 64  ;;  %p4291_p11 = scmp.lt.s32.totalorder %s363_s14, %s363_s14 }
  0x59   : > { %p4284_p8 = scmp.ne.s32.totalorder %s363_s14, %s4283_s27  ;;  %p4292_p12 = scmp.lt.s32.totalorder %s4283_s27, %s4283_s27 }
  0x5b   : > { %p4286_p9 = pnand %p4284_p8, %p4476_p7  ;;  %p4293_p2 = por %p4292_p12, %p4291_p11 }
  0x5d   : > { %p4287_p10 = pneg %p4286_p9 }
  0x5f   : > { %p4294_p3 = pnand %p4293_p2, %p4287_p10 }
  0x61   : > { %4297 = shalt.err (!%p4294_p3)
}
  0x62   : > { %4069 = dma.hbm_to_vmem [thread:$0]  (!%p4460_p5), %s5025_s6, 64, %s363_s14, [#allocation5], %s4350_s15, %s4350_s15, %s4351_s16  }
  0x63   : > { %s4352_s12 = smov [#allocation9]   ;;  %s4298_s19 = scalar_lea.hbm %s5027_s8, 512 }
  0x64   : > { %s388_s21 = sshll.u32 %s4352_s12, 4  ;;  %p4299_p2 = scmp.ne.s32.totalorder %s5027_s8, %s4298_s19  ;;  %s389_s21 = int_to_ptr.vmem [resolvable:$true] %s388_s21 }
  0x65   : > { %p4305_p0 = scmp.lt.u32.totalorder %s4298_s19, %s5027_s8 }
  0x66   : > { %p4301_p3 = pnand %p4299_p2, %p4476_p7 }
  0x68   : > { %p4302_p13 = pneg %p4301_p3 }
  0x6a   : > { %p4307_p1 = pnand %p4305_p0, %p4302_p13 }
  0x6c   : > { %4310 = shalt.err (!%p4307_p1)
}
  0x6d   : > { %s4311_s14 = scalar_lea.vmem %s389_s21, 512  ;;  %p4319_p9 = scmp.lt.s32.totalorder %s389_s21, %s389_s21 }
  0x6e   : > { %p4312_p4 = scmp.ne.s32.totalorder %s389_s21, %s4311_s14  ;;  %p4320_p10 = scmp.lt.s32.totalorder %s4311_s14, %s4311_s14 }
  0x70   : > { %p4314_p6 = pnand %p4312_p4, %p4476_p7  ;;  %p4321_p11 = por %p4320_p10, %p4319_p9 }
  0x72   : > { %p4315_p8 = pneg %p4314_p6 }
  0x74   : > { %p4322_p12 = pnand %p4321_p11, %p4315_p8 }
  0x76   : > { %4325 = shalt.err (!%p4322_p12)
}
  0x77   : > { %s4353_s15 = smov 128   ;;  %s4354_s16 = smov 8  }
  0x78   : > { %4075 = dma.hbm_to_vmem [thread:$0]  (!%p4460_p5), %s5027_s8, 512, %s389_s21, [#allocation8], %s4353_s15, %s4353_s15, %s4354_s16  }
  0x79   : > { %p5047_p2 = scmp.ne.s32.totalorder %s5044_s23, 0 }
  0x7a   : > { %p5048_p3 = scmp.eq.s32.totalorder (!%p5047_p2), %s4443_s22, 0 }
  0x7b   : > { %427 = sbr.rel (%p5047_p2) target bundleno = 6165 (0x1815), region = 68 }
  0x82   : > { %4331 = dma.done.wait (%p5048_p3), [#allocation3], 48   ;;  %p5049_p7 = pmov %p5048_p3 }
  0x83   : > { %p5050_p13 = pmov %p5048_p3 }
  0x84   : > { %4333 = vsyncadd (%p5049_p7), [#allocation3], 4294967248 }
  0x85   : > { %4335 = dma.done.wait (%p5050_p13), [#allocation5], 112   ;;  %p5051_p0 = pmov %p5048_p3 }
  0x87   : > { %4337 = vsyncadd (%p5051_p0), [#allocation5], 4294967184  ;;  %p5052_p1 = pmov %p5051_p0 }
  0x88   : > { %p5053_p5 = pmov %p5051_p0 }
  0x89   : > { %4339 = dma.done.wait (%p5052_p1), [#allocation8], 576  }
  0x8a   : > { %4341 = vsyncadd (%p5053_p5), [#allocation8], 4294966720  ;;  %p487_p4 = scmp.lt.s32.totalorder %s4443_s22, 1  ;;  %v4355_v0 = vmov 0.0|0.0   ;;  %vm4356_vm0 = vmmov 0   ;;  %v4357_v1 = vmov 0.0  }
  0x8b   : > { %3980 = vmatprep.subr.bf16.mxu1 %v4355_v0  ;;  %3761 = vmatprep.mubr.msk.f32.mxu1 %vm4356_vm0, %v4357_v1  ;;  %v501_v2 = vld [vmem:[%s5021_s2] sm:$0xff]  ;;  %v502_v3 = vld [vmem:[%s5021_s2 + $0x8] sm:$0xff]  ;;  %v503_v4 = vld [vmem:[%s5021_s2 + $0x10] sm:$0xff]  ;;  %vm512_vm1 = vcmask 261120   ;;  %s4359_s13 = smov 96   ;;  %s4360_s14 = smov 80  }
  0x8c   : > { %3774 = vmatprep.subr.mxu0 %v4357_v1  ;;  %3776 = vmatprep.mubr.msk.f32.mxu0 %vm4356_vm0, %v4357_v1  ;;  %s5061_s22 = smov (!%p487_p4, %s4443_s22), 1  ;;  %v3981_v5 = vpack.c.bf16 %v502_v3, %v501_v2  ;;  %v504_v6 = vld [vmem:[%s5021_s2 + $0x18] sm:$0xff]  ;;  %v3577_v9 = vld [vmem:[#allocation2] ss:$0 sm:$0xff]  ;;  %s4361_s15 = smov 88   ;;  %vm589_vm2 = vcmask 64512  }
  0x8d   : > { %s4628_s19 = sshll.u32 %s5061_s22, 3  ;;  %v3984_v7 = vpack.c.bf16 %v504_v6, %v503_v4  ;;  %s4358_s22 = smov 120   ;;  %vm1263_vm3 = vcmask 130048   ;;  %vm1265_vm4 = vcmask 195584   ;;  %vm3337_vm5 = vcmask 523264  }
  0x8e   : > { %3982 = vmatpush3.bf16.msra.mxu1 %v3981_v5  ;;  %s490_s29 = scalar_lea.vmem %s5019_s0, %s4628_s19  ;;  %s4362_s16 = smov 72  }
  0x8f   : > { %3983 = vmatprep.subr.bf16.mxu1 %v4355_v0  ;;  %v4635_v8 = vld [vmem:[%s490_s29] sm:$0xff]  ;;  %s4363_s27 = smov 112   ;;  %s4364_s30 = smov 104  }
  0x90   : > { %s4365_s23 = smov 56   ;;  %s4366_s28 = smov 64  }
  0x91   : > { %s4367_s20 = smov 48   ;;  %s5041_s25 = smov 40  }
  0x92   : > { %3985 = vmatpush3.bf16.msra.mxu1 %v3984_v7  ;;  %s5039_s24 = smov 8   ;;  %s5037_s17 = smov 16  }
  0x93   : > { %3764 = vmatprep.subr.mxu1 %v4357_v1  ;;  %s5035_s18 = smov 24   ;;  %s5056_s21 = smov 16  }
  0x94   : > { %s5058_s26 = sld [smem:[#allocation14_spill]] }
  0x95   : > { %3762 = vmatmul.mubr.msk.f32.vlgmr.msra.gmra.mrb[0].mxu1 %vm512_vm1, %v4635_v8 }
  0x96   : > { %3766 = vmatprep.mubr.msk.f32.mxu1 %vm4356_vm0, %v4357_v1 }
  0x9a   : > { %s498_s29 = scalar_lea.vmem %s5058_s26, %s4628_s19 }
 0x168   : > { %v582_v10 = vpop.f32.mrb[0].mxu1 }
 0x169   : > { %v4642_v11 = vadd.f32 %v3577_v9, %v582_v10  ;;  %v3763_v12 = vpop.f32.mrb[1].mxu1 }
 0x16a   : > { %v1268_v12 = vld [vmem:[%s5023_s4 + $0x8] sm:$0xff] }
 0x16b   : > { %752 = vrot.lane.b32.xlu1 %v4642_v11, %s4358_s22  ;;  %587 = vrot.lane.b32.xlu0 %v4642_v11, %s4359_s13 }
 0x16f   : > { %920 = vrot.lane.b32.xlu1 %v4642_v11, %s4360_s14  ;;  %754 = vrot.lane.b32.xlu0 %v4642_v11, %s4361_s15 }
 0x173   : > { %1086 = vrot.lane.b32.xlu1 %v4642_v11, %s4362_s16  ;;  %918 = vrot.lane.b32.xlu0 %v4642_v11, %s4363_s27 }
 0x177   : > { %1084 = vrot.lane.b32.xlu0 %v4642_v11, %s4364_s30 }
 0x1dd   : > { %v753_v13 = vpop.permute.xlu1 %752  ;;  %v588_v14 = vpop.permute.xlu0 %587 }
 0x1de   : > { %3765 = vmatpush3.xpose.msk.msra.mxu1 %vm589_vm2, %v588_v14 }
 0x1df   : > { %3769 = vmatprep.subr.mxu1 %v4357_v1 }
 0x1e1   : > { %3767 = vmatmul.mubr.msk.f32.vlgmr.msra.gmra.mrb[2].mxu1 %vm589_vm2, %v4642_v11  ;;  %v755_v15 = vpop.permute.xlu0 %754  ;;  %v921_v16 = vpop.permute.xlu1 %920 }
 0x1e2   : > { %3775 = vmatpush3.xpose.msk.msra.mxu0 %vm589_vm2, %v755_v15  ;;  %3771 = vmatprep.mubr.msk.f32.mxu1 %vm4356_vm0, %v4357_v1 }
 0x1e3   : > { %3784 = vmatprep.subr.mxu0 %v4357_v1 }
 0x1e5   : > { %3777 = vmatmul.mubr.msk.f32.vlgmr.msra.gmra.mrb[0].mxu0 %vm589_vm2, %v753_v13  ;;  %v919_v17 = vpop.permute.xlu0 %918  ;;  %v1087_v18 = vpop.permute.xlu1 %1086 }
 0x1e6   : > { %3785 = vmatpush3.xpose.msk.msra.mxu0 %vm589_vm2, %v921_v16  ;;  %3786 = vmatprep.mubr.msk.f32.mxu0 %vm4356_vm0, %v4357_v1 }
 0x1e7   : > { %3794 = vmatprep.subr.mxu0 %v4357_v1 }
 0x1e9   : > { %3787 = vmatmul.mubr.msk.f32.vlgmr.msra.gmra.mrb[2].mxu0 %vm589_vm2, %v919_v17  ;;  %v1085_v19 = vpop.permute.xlu0 %1084 }
 0x1ea   : > { %3795 = vmatpush3.xpose.msk.msra.mxu0 %vm589_vm2, %v1087_v18  ;;  %3796 = vmatprep.mubr.msk.f32.mxu0 %vm4356_vm0, %v4357_v1  ;;  %v1269_v18 = vld [vmem:[%s5023_s4 + $0x10] sm:$0xff] }
 0x1eb   : > { %3986 = vmatprep.subr.bf16.mxu0 %v4355_v0 }
 0x1ed   : > { %3797 = vmatmul.mubr.msk.f32.vlgmr.msra.gmra.mrb[4].mxu0 %vm589_vm2, %v1085_v19  ;;  %v1270_v19 = vld [vmem:[%s5023_s4 + $0x18] sm:$0xff] }
 0x1ee   : > { %3812 = vmatprep.mubr.msk.f32.mxu0 %vm4356_vm0, %v4357_v1 }
 0x2b4   : > { %v660_v20 = vpop.f32.mrb[2].mxu1 }
 0x2b5   : > { %v664_v21 = vmul.f32 0.35355338, %v660_v20  ;;  %v3768_v22 = vpop.f32.mrb[3].mxu1  ;;  %v3990_v20 = vpack.c.bf16 %v1270_v19, %v1269_v18 }
 0x2b7   : > { %v665_v23 = vsel %vm589_vm2, %v664_v21, -inf }
 0x2b8   : > { %v826_v24 = vpop.f32.mrb[0].mxu0  ;;  %666 = vmax.xlane.f32.xlu1 %v665_v23 }
 0x2b9   : > { %v830_v25 = vmul.f32 0.35355338, %v826_v24  ;;  %v3778_v26 = vpop.f32.mrb[1].mxu0 }
 0x2bb   : > { %v831_v27 = vsel %vm589_vm2, %v830_v25, -inf }
 0x2bc   : > { %832 = vmax.xlane.f32.xlu0 %v831_v27  ;;  %v992_v28 = vpop.f32.mrb[2].mxu0 }
 0x2bd   : > { %v996_v29 = vmul.f32 0.35355338, %v992_v28  ;;  %v3788_v30 = vpop.f32.mrb[3].mxu0 }
 0x2bf   : > { %v997_v31 = vsel %vm589_vm2, %v996_v29, -inf }
 0x2c0   : > { %998 = vmax.xlane.f32.xlu0 %v997_v31  ;;  %v1158_v32 = vpop.f32.mrb[4].mxu0  ;;  %v3591_v31 = vld [vmem:[#allocation4] ss:$0 sm:$0xff] }
 0x2c1   : > { %v1162_v33 = vmul.f32 0.35355338, %v1158_v32  ;;  %v3798_v34 = vpop.f32.mrb[5].mxu0 }
 0x2c3   : > { %v1163_v35 = vsel %vm589_vm2, %v1162_v33, -inf }
 0x2c4   : > { %1164 = vmax.xlane.f32.xlu1 %v1163_v35 }
 0x2d5   : > { %842 = vrot.lane.b32.xlu1 %v4642_v11, %s4365_s23 }
 0x345   : > { %v667_v36 = vpop.xlane.xlu1 %666 }
 0x346   : > { %v668_v37 = vsub.f32 %v664_v21, %v667_v36 }
 0x348   : > { %v669_v38 = vmul.f32 1.442695, %v668_v37 }
 0x349   : > { %v833_v39 = vpop.xlane.xlu0 %832 }
 0x34a   : > { %4130 = vpow2.f32 %v669_v38  ;;  %v834_v40 = vsub.f32 %v830_v25, %v833_v39 }
 0x34c   : > { %v835_v41 = vmul.f32 1.442695, %v834_v40 }
 0x34d   : > { %v999_v51 = vpop.xlane.xlu0 %998 }
 0x34e   : > { %4132 = vpow2.f32 %v835_v41  ;;  %v1000_v52 = vsub.f32 %v996_v29, %v999_v51  ;;  %v3593_v51 = vld [vmem:[#allocation6 + $0x3] ss:$0 sm:$0xff] }
 0x350   : > { %v1001_v53 = vmul.f32 1.442695, %v1000_v52 }
 0x351   : > { %v1165_v42 = vpop.xlane.xlu1 %1164 }
 0x352   : > { %v1166_v43 = vsub.f32 %v1162_v33, %v1165_v42  ;;  %v3595_v42 = vld [vmem:[%s5021_s2 + $0x20] sm:$0xff] }
 0x354   : > { %v4131_v44 = vpop.eup %4130  ;;  %v1167_v45 = vmul.f32 1.442695, %v1166_v43  ;;  %v3596_v43 = vld [vmem:[%s5021_s2 + $0x28] sm:$0xff] }
 0x355   : > { %v671_v46 = vsel %vm589_vm2, %v4131_v44, 0.0  ;;  %v843_v56 = vpop.permute.xlu1 %842 }
 0x356   : > { %4134 = vpow2.f32 %v1167_v45  ;;  %672 = vadd.xlane.f32.xlu0 %v671_v46  ;;  %v3598_v45 = vld [vmem:[%s5021_s2 + $0x38] sm:$0xff] }
 0x357   : > { %4136 = vpow2.f32 %v1001_v53  ;;  %v3594_v53 = vld [vmem:[#allocation7 + $0x3] ss:$0 sm:$0xff] }
 0x358   : > { %v4133_v47 = vpop.eup %4132 }
 0x359   : > { %v837_v48 = vsel %vm589_vm2, %v4133_v47, 0.0 }
 0x35a   : > { %838 = vadd.xlane.f32.xlu1 %v837_v48 }
 0x360   : > { %v4135_v49 = vpop.eup %4134 }
 0x361   : > { %v1169_v50 = vsel %vm589_vm2, %v4135_v49, 0.0  ;;  %v4137_v54 = vpop.eup %4136 }
 0x362   : > { %1170 = vadd.xlane.f32.xlu1 %v1169_v50  ;;  %v1003_v55 = vsel %vm589_vm2, %v4137_v54, 0.0 }
 0x36c   : > { %676 = vrot.lane.b32.xlu0 %v4642_v11, %s4366_s28 }
 0x373   : > { %1008 = vrot.lane.b32.xlu1 %v4642_v11, %s4367_s20 }
 0x38b   : > { %1004 = vadd.xlane.f32.xlu0 %v1003_v55 }
 0x3a1   : > { %1174 = vrot.lane.b32.xlu0 %v4642_v11, %s5041_s25  ;;  %v1267_v11 = vld [vmem:[%s5023_s4] sm:$0xff]  ;;  %s494_s25 = scalar_lea.vmem %s5020_s1, %s4628_s19 }
 0x3a2   : > { %v3987_v13 = vpack.c.bf16 %v1268_v12, %v1267_v11 }
 0x3a4   : > { %3988 = vmatpush3.bf16.msra.mxu0 %v3987_v13 }
 0x3a5   : > { %3989 = vmatprep.subr.bf16.mxu0 %v4355_v0 }
 0x3a8   : > { %3991 = vmatpush3.bf16.msra.mxu0 %v3990_v20 }
 0x3a9   : > { %3826 = vmatprep.subr.mxu0 %v4357_v1 }
 0x3e3   : > { %v673_v57 = vpop.xlane.xlu0 %672 }
 0x3e4   : > { %4138 = vrcp.f32 %v673_v57 }
 0x3e7   : > { %v677_v58 = vpop.permute.xlu0 %676  ;;  %v839_v59 = vpop.xlane.xlu1 %838 }
 0x3e8   : > { %4140 = vrcp.f32 %v839_v59  ;;  %3770 = vmatpush3.msra.mxu1 %v677_v58 }
 0x3e9   : > { %3779 = vmatprep.subr.mxu1 %v4357_v1 }
 0x3ee   : > { %v4139_v60 = vpop.eup %4138 }
 0x3ef   : > { %v675_v61 = vmul.f32 %v4139_v60, %v4131_v44  ;;  %v1171_v62 = vpop.xlane.xlu1 %1170  ;;  %v3993_v44 = vpack.c.bf16 %v3596_v43, %v3595_v42 }
 0x3f1   : > { %3772 = vmatmul.mubr.msk.f32.vlgmr.msra.gmra.mrb[4].mxu1 %vm589_vm2, %v675_v61 }
 0x3f2   : > { %v4141_v63 = vpop.eup %4140  ;;  %3780 = vmatpush3.msra.mxu1 %v843_v56  ;;  %3781 = vmatprep.mubr.msk.f32.mxu1 %vm4356_vm0, %v4357_v1  ;;  %v3599_v56 = vld [vmem:[#allocation2 + $0x1] ss:$0 sm:$0xff] }
 0x3f3   : > { %v841_v2 = vmul.f32 %v4141_v63, %v4133_v47  ;;  %v1009_v3 = vpop.permute.xlu1 %1008  ;;  %3789 = vmatprep.subr.mxu1 %v4357_v1 }
 0x3f5   : > { %3782 = vmatmul.mubr.msk.f32.vlgmr.msra.gmra.mrb[6].mxu1 %vm589_vm2, %v841_v2 }
 0x3f6   : > { %3790 = vmatpush3.msra.mxu1 %v1009_v3  ;;  %3791 = vmatprep.mubr.msk.f32.mxu1 %vm4356_vm0, %v4357_v1 }
 0x3f7   : > { %3799 = vmatprep.subr.mxu1 %v4357_v1 }
 0x418   : > { %v1005_v4 = vpop.xlane.xlu0 %1004 }
 0x419   : > { %4142 = vrcp.f32 %v1005_v4 }
 0x41a   : > { %4144 = vrcp.f32 %v1171_v62 }
 0x41c   : > { %v1175_v9 = vpop.permute.xlu0 %1174 }
 0x423   : > { %v4143_v5 = vpop.eup %4142 }
 0x424   : > { %v1007_v6 = vmul.f32 %v4143_v5, %v4137_v54  ;;  %v4145_v7 = vpop.eup %4144 }
 0x425   : > { %v1173_v10 = vmul.f32 %v4145_v7, %v4135_v49 }
 0x426   : > { %3792 = vmatmul.mubr.msk.f32.vlgmr.msra.gmra.mrb[8].mxu1 %vm589_vm2, %v1007_v6 }
 0x427   : > { %3800 = vmatpush3.msra.mxu1 %v1175_v9  ;;  %3801 = vmatprep.mubr.msk.f32.mxu1 %vm4356_vm0, %v4357_v1 }
 0x428   : > { %3992 = vmatprep.subr.bf16.mxu1 %v4355_v0 }
 0x42a   : > { %3802 = vmatmul.mubr.msk.f32.vlgmr.msra.gmra.mrb[10].mxu1 %vm589_vm2, %v1173_v10 }
 0x42b   : > { %3823 = vmatprep.mubr.msk.f32.mxu1 %vm4356_vm0, %v4357_v1  ;;  %3994 = vmatpush3.bf16.msra.mxu1 %v3993_v44 }
 0x42c   : > { %3995 = vmatprep.subr.bf16.mxu1 %v4355_v0 }
 0x4c4   : > { %v748_v14 = vpop.f32.mrb[4].mxu1 }
 0x4c5   : > { %v3773_v15 = vpop.f32.mrb[5].mxu1 }
 0x4c8   : > { %v914_v16 = vpop.f32.mrb[6].mxu1 }
 0x4c9   : > { %1251 = vrot.lane.b32.xlu1 %v914_v16, %s5039_s24  ;;  %v3783_v17 = vpop.f32.mrb[7].mxu1 }
 0x4f9   : > { %v1080_v21 = vpop.f32.mrb[8].mxu1 }
 0x4fa   : > { %1255 = vrot.lane.b32.xlu0 %v1080_v21, %s5037_s17  ;;  %v3793_v22 = vpop.f32.mrb[9].mxu1  ;;  %s5055_s17 = smov 8  }
 0x4fd   : > { %v1246_v23 = vpop.f32.mrb[10].mxu1 }
 0x4fe   : > { %1259 = vrot.lane.b32.xlu1 %v1246_v23, %s5035_s18  ;;  %v3803_v24 = vpop.f32.mrb[11].mxu1 }
 0x53b   : > { %v1252_v25 = vpop.permute.xlu1 %1251 }
 0x53c   : > { %v1262_v27 = vsel %vm589_vm2, %v748_v14, %v1252_v25 }
 0x56c   : > { %v1256_v26 = vpop.permute.xlu0 %1255 }
 0x56d   : > { %v1264_v28 = vsel %vm1263_vm3, %v1262_v27, %v1256_v26 }
 0x570   : > { %v1260_v29 = vpop.permute.xlu1 %1259 }
 0x571   : > { %v1266_v30 = vsel %vm1265_vm4, %v1264_v28, %v1260_v29 }
 0x572   : > { %3813 = vmatmul.mubr.msk.f32.vlgmr.msra.gmra.mrb[6].mxu0 %vm512_vm1, %v1266_v30 }
 0x573   : > { %3828 = vmatprep.mubr.msk.f32.mxu0 %vm4356_vm0, %v4357_v1 }
 0x645   : > { %v1347_v32 = vpop.f32.mrb[6].mxu0 }
 0x646   : > { %v1348_v33 = vadd.f32 %v3591_v31, %v1347_v32  ;;  %v3814_v34 = vpop.f32.mrb[7].mxu0 }
 0x648   : > { %v1351_v35 = vadd.f32 %v1348_v33, %v4635_v8  ;;  %v3597_v8 = vld [vmem:[%s5021_s2 + $0x30] sm:$0xff] }
 0x649   : > { %v3996_v46 = vpack.c.bf16 %v3598_v45, %v3597_v8 }
 0x64a   : > { %v1352_v36 = vsel %vm512_vm1, %v1351_v35, 0.0 }
 0x64b   : > { %1353 = vadd.xlane.f32.xlu0 %v1352_v36  ;;  %3997 = vmatpush3.bf16.msra.mxu1 %v3996_v46 }
 0x64c   : > { %3831 = vmatprep.subr.mxu1 %v4357_v1 }
 0x6d8   : > { %v1354_v37 = vpop.xlane.xlu0 %1353 }
 0x6d9   : > { %v1356_v38 = vmul.f32 0.03125, %v1354_v37 }
 0x6db   : > { %v1357_v39 = vsub.f32 %v1351_v35, %v1356_v38 }
 0x6dd   : > { %v1358_v40 = vmul.f32 %v1357_v39, %v1357_v39 }
 0x6df   : > { %v1359_v41 = vsel %vm512_vm1, %v1358_v40, 0.0 }
 0x6e0   : > { %1360 = vadd.xlane.f32.xlu1 %v1359_v41 }
 0x76d   : > { %v1361_v47 = vpop.xlane.xlu1 %1360 }
 0x76e   : > { %v1362_v48 = vmul.f32 0.03125, %v1361_v47 }
 0x770   : > { %v1363_v49 = vadd.f32 1e-05, %v1362_v48 }
 0x772   : > { %4146 = vrsqrt.f32 %v1363_v49 }
 0x77c   : > { %v4147_v50 = vpop.eup %4146 }
 0x77d   : > { %v1365_v52 = vmul.f32 %v4147_v50, %v1357_v39 }
 0x77f   : > { %v1374_v54 = vmul.f32 %v3593_v51, %v1365_v52 }
 0x781   : > { %v4751_v55 = vadd.f32 %v3594_v53, %v1374_v54 }
 0x783   : > { %3824 = vmatmul.mubr.msk.f32.vlgmr.msra.gmra.mrb[12].mxu1 %vm512_vm1, %v4751_v55 }
 0x784   : > { %3833 = vmatprep.mubr.msk.f32.mxu1 %vm4356_vm0, %v4357_v1 }
 0x856   : > { %v1466_v57 = vpop.f32.mrb[12].mxu1 }
 0x857   : > { %v4757_v58 = vadd.f32 %v3599_v56, %v1466_v57  ;;  %v3825_v59 = vpop.f32.mrb[13].mxu1 }
 0x858   : > { %v3614_v59 = vld [vmem:[%s5023_s4 + $0x28] sm:$0xff] }
 0x859   : > { %1637 = vrot.lane.b32.xlu1 %v4757_v58, %s4361_s15  ;;  %1471 = vrot.lane.b32.xlu0 %v4757_v58, %s4359_s13 }
 0x85d   : > { %1803 = vrot.lane.b32.xlu1 %v4757_v58, %s4360_s14  ;;  %1635 = vrot.lane.b32.xlu0 %v4757_v58, %s4358_s22 }
 0x861   : > { %1969 = vrot.lane.b32.xlu1 %v4757_v58, %s4362_s16  ;;  %1801 = vrot.lane.b32.xlu0 %v4757_v58, %s4363_s27 }
 0x865   : > { %1967 = vrot.lane.b32.xlu0 %v4757_v58, %s4364_s30 }
 0x8cb   : > { %v1638_v60 = vpop.permute.xlu1 %1637  ;;  %v1472_v61 = vpop.permute.xlu0 %1471 }
 0x8cc   : > { %3827 = vmatpush3.xpose.msk.msra.mxu0 %vm589_vm2, %v1472_v61 }
 0x8cd   : > { %3836 = vmatprep.subr.mxu0 %v4357_v1 }
 0x8cf   : > { %3829 = vmatmul.mubr.msk.f32.vlgmr.msra.gmra.mrb[8].mxu0 %vm589_vm2, %v4757_v58  ;;  %v1636_v62 = vpop.permute.xlu0 %1635  ;;  %v1804_v63 = vpop.permute.xlu1 %1803 }
 0x8d0   : > { %3837 = vmatpush3.xpose.msk.msra.mxu0 %vm589_vm2, %v1638_v60  ;;  %3838 = vmatprep.mubr.msk.f32.mxu0 %vm4356_vm0, %v4357_v1 }
 0x8d1   : > { %3846 = vmatprep.subr.mxu0 %v4357_v1 }
 0x8d3   : > { %3839 = vmatmul.mubr.msk.f32.vlgmr.msra.gmra.mrb[10].mxu0 %vm589_vm2, %v1636_v62  ;;  %v1802_v2 = vpop.permute.xlu0 %1801  ;;  %v1970_v3 = vpop.permute.xlu1 %1969 }
 0x8d4   : > { %3847 = vmatpush3.xpose.msk.msra.mxu0 %vm589_vm2, %v1804_v63  ;;  %3848 = vmatprep.mubr.msk.f32.mxu0 %vm4356_vm0, %v4357_v1 }
 0x8d5   : > { %3856 = vmatprep.subr.mxu0 %v4357_v1 }
 0x8d7   : > { %3849 = vmatmul.mubr.msk.f32.vlgmr.msra.gmra.mrb[12].mxu0 %vm589_vm2, %v1802_v2  ;;  %v1968_v4 = vpop.permute.xlu0 %1967 }
 0x8d8   : > { %3857 = vmatpush3.xpose.msk.msra.mxu0 %vm589_vm2, %v1970_v3  ;;  %3858 = vmatprep.mubr.msk.f32.mxu0 %vm4356_vm0, %v4357_v1  ;;  %v3615_v3 = vld [vmem:[%s5023_s4 + $0x30] sm:$0xff] }
 0x8d9   : > { %3998 = vmatprep.subr.bf16.mxu0 %v4355_v0 }
 0x8db   : > { %3859 = vmatmul.mubr.msk.f32.vlgmr.msra.gmra.mrb[14].mxu0 %vm589_vm2, %v1968_v4  ;;  %v3616_v4 = vld [vmem:[%s5023_s4 + $0x38] sm:$0xff] }
 0x8dc   : > { %3874 = vmatprep.mubr.msk.f32.mxu0 %vm4356_vm0, %v4357_v1 }
 0x9a2   : > { %v1543_v5 = vpop.f32.mrb[8].mxu0 }
 0x9a3   : > { %v1547_v6 = vmul.f32 0.35355338, %v1543_v5  ;;  %v3830_v7 = vpop.f32.mrb[9].mxu0  ;;  %v4002_v5 = vpack.c.bf16 %v3616_v4, %v3615_v3 }
 0x9a5   : > { %v1548_v9 = vsel %vm589_vm2, %v1547_v6, -inf }
 0x9a6   : > { %1549 = vmax.xlane.f32.xlu1 %v1548_v9  ;;  %v1709_v10 = vpop.f32.mrb[10].mxu0 }
 0x9a7   : > { %v1713_v11 = vmul.f32 0.35355338, %v1709_v10  ;;  %v3840_v12 = vpop.f32.mrb[11].mxu0 }
 0x9a9   : > { %v1714_v13 = vsel %vm589_vm2, %v1713_v11, -inf }
 0x9aa   : > { %1715 = vmax.xlane.f32.xlu0 %v1714_v13  ;;  %v1875_v14 = vpop.f32.mrb[12].mxu0 }
 0x9ab   : > { %v1879_v15 = vmul.f32 0.35355338, %v1875_v14  ;;  %v3850_v16 = vpop.f32.mrb[13].mxu0 }
 0x9ad   : > { %v1880_v17 = vsel %vm589_vm2, %v1879_v15, -inf }
 0x9ae   : > { %1881 = vmax.xlane.f32.xlu0 %v1880_v17  ;;  %v2041_v18 = vpop.f32.mrb[14].mxu0  ;;  %v3617_v17 = vld [vmem:[#allocation4 + $0x1] ss:$0 sm:$0xff] }
 0x9af   : > { %v2045_v19 = vmul.f32 0.35355338, %v2041_v18  ;;  %v3860_v20 = vpop.f32.mrb[15].mxu0 }
 0x9b1   : > { %v2046_v21 = vsel %vm589_vm2, %v2045_v19, -inf }
 0x9b2   : > { %2047 = vmax.xlane.f32.xlu1 %v2046_v21 }
 0x9c3   : > { %1725 = vrot.lane.b32.xlu1 %v4757_v58, %s4365_s23  ;;  %s5054_s23 = smov 40  }
 0xa33   : > { %v1550_v22 = vpop.xlane.xlu1 %1549 }
 0xa34   : > { %v1551_v23 = vsub.f32 %v1547_v6, %v1550_v22 }
 0xa36   : > { %v1552_v24 = vmul.f32 1.442695, %v1551_v23  ;;  %v3621_v23 = vld [vmem:[%s5021_s2 + $0x40] sm:$0xff] }
 0xa37   : > { %v1716_v25 = vpop.xlane.xlu0 %1715 }
 0xa38   : > { %4148 = vpow2.f32 %v1552_v24  ;;  %v1717_v26 = vsub.f32 %v1713_v11, %v1716_v25  ;;  %v3622_v24 = vld [vmem:[%s5021_s2 + $0x48] sm:$0xff]  ;;  %v3623_v25 = vld [vmem:[%s5021_s2 + $0x50] sm:$0xff] }
 0xa3a   : > { %v1718_v27 = vmul.f32 1.442695, %v1717_v26  ;;  %v4120_v26 = vpack.i.bf16 %v3622_v24, %v3621_v23 }
 0xa3b   : > { %v1882_v37 = vpop.xlane.xlu0 %1881 }
 0xa3c   : > { %4150 = vpow2.f32 %v1718_v27  ;;  %v1883_v38 = vsub.f32 %v1879_v15, %v1882_v37  ;;  %v4005_v27 = vpack.c.bf16 %v3622_v24, %v3621_v23 }
 0xa3e   : > { %v1884_v39 = vmul.f32 1.442695, %v1883_v38 }
 0xa3f   : > { %v2048_v28 = vpop.xlane.xlu1 %2047 }
 0xa40   : > { %v2049_v29 = vsub.f32 %v2045_v19, %v2048_v28 }
 0xa42   : > { %v4149_v30 = vpop.eup %4148  ;;  %v2050_v31 = vmul.f32 1.442695, %v2049_v29 }
 0xa43   : > { %v1554_v32 = vsel %vm589_vm2, %v4149_v30, 0.0  ;;  %v1726_v42 = vpop.permute.xlu1 %1725 }
 0xa44   : > { %4152 = vpow2.f32 %v2050_v31  ;;  %1555 = vadd.xlane.f32.xlu0 %v1554_v32 }
 0xa45   : > { %4154 = vpow2.f32 %v1884_v39  ;;  %v3625_v39 = vld [vmem:[#allocation2 + $0x2] ss:$0 sm:$0xff] }
 0xa46   : > { %v4151_v33 = vpop.eup %4150 }
 0xa47   : > { %v1720_v34 = vsel %vm589_vm2, %v4151_v33, 0.0 }
 0xa48   : > { %1721 = vadd.xlane.f32.xlu1 %v1720_v34 }
 0xa4e   : > { %v4153_v35 = vpop.eup %4152 }
 0xa4f   : > { %v2052_v36 = vsel %vm589_vm2, %v4153_v35, 0.0  ;;  %v4155_v40 = vpop.eup %4154 }
 0xa50   : > { %2053 = vadd.xlane.f32.xlu1 %v2052_v36  ;;  %v1886_v41 = vsel %vm589_vm2, %v4155_v40, 0.0 }
 0xa5a   : > { %1559 = vrot.lane.b32.xlu0 %v4757_v58, %s4366_s28 }
 0xa61   : > { %1891 = vrot.lane.b32.xlu1 %v4757_v58, %s4367_s20 }
 0xa79   : > { %1887 = vadd.xlane.f32.xlu0 %v1886_v41 }
 0xa8f   : > { %2057 = vrot.lane.b32.xlu0 %v4757_v58, %s5054_s23  ;;  %v3613_v58 = vld [vmem:[%s5023_s4 + $0x20] sm:$0xff]  ;;  %s5057_s23 = smov 24  }
 0xa90   : > { %v3999_v60 = vpack.c.bf16 %v3614_v59, %v3613_v58 }
 0xa92   : > { %4000 = vmatpush3.bf16.msra.mxu0 %v3999_v60 }
 0xa93   : > { %4001 = vmatprep.subr.bf16.mxu0 %v4355_v0 }
 0xa96   : > { %4003 = vmatpush3.bf16.msra.mxu0 %v4002_v5 }
 0xa97   : > { %4010 = vmatprep.subr.bf16.mxu0 %v4355_v0 }
 0xad1   : > { %v1556_v43 = vpop.xlane.xlu0 %1555 }
 0xad2   : > { %4156 = vrcp.f32 %v1556_v43 }
 0xad5   : > { %v1722_v44 = vpop.xlane.xlu1 %1721  ;;  %v1560_v8 = vpop.permute.xlu0 %1559 }
 0xad6   : > { %4158 = vrcp.f32 %v1722_v44  ;;  %3832 = vmatpush3.msra.mxu1 %v1560_v8 }
 0xad7   : > { %3841 = vmatprep.subr.mxu1 %v4357_v1 }
 0xadc   : > { %v4157_v45 = vpop.eup %4156 }
 0xadd   : > { %v1558_v46 = vmul.f32 %v4157_v45, %v4149_v30  ;;  %v2054_v47 = vpop.xlane.xlu1 %2053 }
 0xadf   : > { %3834 = vmatmul.mubr.msk.f32.vlgmr.msra.gmra.mrb[14].mxu1 %vm589_vm2, %v1558_v46  ;;  %v500_v46 = vld [vmem:[%s494_s25] sm:$0xff] }
 0xae0   : > { %v4159_v48 = vpop.eup %4158  ;;  %3842 = vmatpush3.msra.mxu1 %v1726_v42  ;;  %3843 = vmatprep.mubr.msk.f32.mxu1 %vm4356_vm0, %v4357_v1 }
 0xae1   : > { %v1724_v49 = vmul.f32 %v4159_v48, %v4151_v33  ;;  %v1892_v50 = vpop.permute.xlu1 %1891  ;;  %3851 = vmatprep.subr.mxu1 %v4357_v1  ;;  %v3619_v48 = vld [vmem:[#allocation6] ss:$0 sm:$0xff] }
 0xae3   : > { %3844 = vmatmul.mubr.msk.f32.vlgmr.msra.gmra.mrb[16].mxu1 %vm589_vm2, %v1724_v49 }
 0xae4   : > { %3852 = vmatpush3.msra.mxu1 %v1892_v50  ;;  %3853 = vmatprep.mubr.msk.f32.mxu1 %vm4356_vm0, %v4357_v1  ;;  %v3620_v50 = vld [vmem:[#allocation7] ss:$0 sm:$0xff] }
 0xae5   : > { %3861 = vmatprep.subr.mxu1 %v4357_v1 }
 0xb06   : > { %v1888_v51 = vpop.xlane.xlu0 %1887 }
 0xb07   : > { %4160 = vrcp.f32 %v1888_v51 }
 0xb08   : > { %4162 = vrcp.f32 %v2054_v47 }
 0xb0a   : > { %v2058_v56 = vpop.permute.xlu0 %2057 }
 0xb11   : > { %v4161_v52 = vpop.eup %4160 }
 0xb12   : > { %v1890_v53 = vmul.f32 %v4161_v52, %v4155_v40  ;;  %v4163_v54 = vpop.eup %4162 }
 0xb13   : > { %v2056_v57 = vmul.f32 %v4163_v54, %v4153_v35 }
 0xb14   : > { %3854 = vmatmul.mubr.msk.f32.vlgmr.msra.gmra.mrb[18].mxu1 %vm589_vm2, %v1890_v53 }
 0xb15   : > { %3862 = vmatpush3.msra.mxu1 %v2058_v56  ;;  %3863 = vmatprep.mubr.msk.f32.mxu1 %vm4356_vm0, %v4357_v1 }
 0xb16   : > { %4004 = vmatprep.subr.bf16.mxu1 %v4355_v0 }
 0xb18   : > { %3864 = vmatmul.mubr.msk.f32.vlgmr.msra.gmra.mrb[20].mxu1 %vm589_vm2, %v2056_v57 }
 0xb19   : > { %3885 = vmatprep.mubr.msk.f32.mxu1 %vm4356_vm0, %v4357_v1  ;;  %4006 = vmatpush3.bf16.msra.mxu1 %v4005_v27 }
 0xb1a   : > { %4007 = vmatprep.subr.bf16.mxu1 %v4355_v0 }
 0xbb2   : > { %v1631_v61 = vpop.f32.mrb[14].mxu1 }
 0xbb3   : > { %v3835_v62 = vpop.f32.mrb[15].mxu1 }
 0xbb6   : > { %v1797_v63 = vpop.f32.mrb[16].mxu1 }
 0xbb7   : > { %2134 = vrot.lane.b32.xlu1 %v1797_v63, %s5055_s17  ;;  %v3845_v2 = vpop.f32.mrb[17].mxu1 }
 0xbe7   : > { %v1963_v6 = vpop.f32.mrb[18].mxu1 }
 0xbe8   : > { %2138 = vrot.lane.b32.xlu0 %v1963_v6, %s5056_s21  ;;  %v3855_v7 = vpop.f32.mrb[19].mxu1 }
 0xbeb   : > { %v2129_v9 = vpop.f32.mrb[20].mxu1 }
 0xbec   : > { %2142 = vrot.lane.b32.xlu1 %v2129_v9, %s5057_s23  ;;  %v3865_v10 = vpop.f32.mrb[21].mxu1 }
 0xc29   : > { %v2135_v11 = vpop.permute.xlu1 %2134 }
 0xc2a   : > { %v2145_v13 = vsel %vm589_vm2, %v1631_v61, %v2135_v11 }
 0xc5a   : > { %v2139_v12 = vpop.permute.xlu0 %2138 }
 0xc5b   : > { %v2146_v14 = vsel %vm1263_vm3, %v2145_v13, %v2139_v12 }
 0xc5e   : > { %v2143_v15 = vpop.permute.xlu1 %2142 }
 0xc5f   : > { %v2147_v16 = vsel %vm1265_vm4, %v2146_v14, %v2143_v15 }
 0xc60   : > { %3875 = vmatmul.mubr.msk.f32.vlgmr.msra.gmra.mrb[16].mxu0 %vm512_vm1, %v2147_v16 }
 0xc61   : > { %3896 = vmatprep.mubr.msk.f32.mxu0 %vm4356_vm0, %v4357_v1 }
 0xd33   : > { %v2230_v18 = vpop.f32.mrb[16].mxu0 }
 0xd34   : > { %v2231_v19 = vadd.f32 %v3617_v17, %v2230_v18  ;;  %v3876_v20 = vpop.f32.mrb[17].mxu0 }
 0xd36   : > { %v2234_v21 = vadd.f32 %v2231_v19, %v4751_v55  ;;  %v3624_v55 = vld [vmem:[%s5021_s2 + $0x58] sm:$0xff] }
 0xd37   : > { %v4125_v28 = vpack.i.bf16 %v3624_v55, %v3623_v25  ;;  %v4008_v29 = vpack.c.bf16 %v3624_v55, %v3623_v25 }
 0xd38   : > { %v2235_v22 = vsel %vm512_vm1, %v2234_v21, 0.0 }
 0xd39   : > { %2236 = vadd.xlane.f32.xlu0 %v2235_v22  ;;  %4009 = vmatpush3.bf16.msra.mxu1 %v4008_v29 }
 0xd3a   : > { %3899 = vmatprep.subr.mxu1 %v4357_v1 }
 0xd4f   : > { %4121 = vrot.lane.b32.xlu0 %v4120_v26, %s4359_s13 }
 0xd53   : > { %2366 = vrot.lane.b32.xlu0 %v3625_v39, %s4359_s13 }
 0xdc6   : > { %v2237_v30 = vpop.xlane.xlu0 %2236 }
 0xdc7   : > { %v2238_v31 = vmul.f32 0.03125, %v2237_v30 }
 0xdc9   : > { %v2239_v32 = vsub.f32 %v2234_v21, %v2238_v31 }
 0xdca   : > { %v4122_v35 = vpop.permute.xlu0 %4121 }
 0xdcb   : > { %v2240_v33 = vmul.f32 %v2239_v32, %v2239_v32  ;;  %v4124_v36 = vunpack.i.h.bf16 %v4122_v35  ;;  %v4123_v37 = vunpack.i.l.bf16 %v4122_v35 }
 0xdcd   : > { %v2241_v34 = vsel %vm512_vm1, %v2240_v33, 0.0  ;;  %v4011_v38 = vpack.c.bf16 %v4124_v36, %v4123_v37 }
 0xdce   : > { %2242 = vadd.xlane.f32.xlu1 %v2241_v34  ;;  %v2367_v53 = vpop.permute.xlu0 %2366 }
 0xdcf   : > { %4012 = vmatpush3.bf16.msra.mxu0 %v4011_v38 }
 0xdd0   : > { %4013 = vmatprep.subr.bf16.mxu0 %v4355_v0 }
 0xddf   : > { %4126 = vrot.lane.b32.xlu1 %v4125_v28, %s4359_s13 }
 0xe5b   : > { %v2243_v40 = vpop.xlane.xlu1 %2242 }
 0xe5c   : > { %v2244_v41 = vmul.f32 0.03125, %v2243_v40 }
 0xe5e   : > { %v2245_v42 = vadd.f32 1e-05, %v2244_v41 }
 0xe5f   : > { %v4127_v43 = vpop.permute.xlu1 %4126 }
 0xe60   : > { %4164 = vrsqrt.f32 %v2245_v42  ;;  %v4129_v44 = vunpack.i.h.bf16 %v4127_v43  ;;  %v4128_v8 = vunpack.i.l.bf16 %v4127_v43 }
 0xe62   : > { %v4014_v45 = vpack.c.bf16 %v4129_v44, %v4128_v8 }
 0xe64   : > { %4015 = vmatpush3.bf16.msra.mxu0 %v4014_v45 }
 0xe65   : > { %3909 = vmatprep.subr.mxu0 %v4357_v1 }
 0xe67   : > { %3897 = vmatmul.mubr.msk.f32.vlgmr.msra.gmra.mrb[18].mxu0 %vm512_vm1, %v500_v46 }
 0xe68   : > { %3911 = vmatprep.mubr.msk.f32.mxu0 %vm4356_vm0, %v4357_v1 }
 0xe6a   : > { %v4165_v47 = vpop.eup %4164 }
 0xe6b   : > { %v2247_v49 = vmul.f32 %v4165_v47, %v2239_v32 }
 0xe6d   : > { %v2255_v51 = vmul.f32 %v3619_v48, %v2247_v49 }
 0xe6f   : > { %v4878_v52 = vadd.f32 %v3620_v50, %v2255_v51 }
 0xe71   : > { %3886 = vmatmul.mubr.msk.f32.vlgmr.msra.gmra.mrb[22].mxu1 %vm512_vm1, %v4878_v52 }
 0xe72   : > { %3901 = vmatprep.mubr.msk.f32.mxu1 %vm4356_vm0, %v4357_v1 }
 0xf3a   : > { %v2438_v54 = vpop.f32.mrb[18].mxu0 }
 0xf3b   : > { %v4884_v56 = vadd.f32 %v2438_v54, %v2367_v53  ;;  %v3898_v57 = vpop.f32.mrb[19].mxu0 }
 0xf3d   : > { %2608 = vrot.lane.b32.xlu1 %v4884_v56, %s4358_s22  ;;  %3900 = vmatpush3.xpose.msk.msra.mxu1 %vm589_vm2, %v4884_v56 }
 0xf3e   : > { %3904 = vmatprep.subr.mxu1 %v4357_v1 }
 0xf41   : > { %2774 = vrot.lane.b32.xlu1 %v4884_v56, %s4363_s27 }
 0xf44   : > { %v2346_v58 = vpop.f32.mrb[22].mxu1 }
 0xf45   : > { %v2347_v59 = vadd.f32 %v3625_v39, %v2346_v58  ;;  %2940 = vrot.lane.b32.xlu1 %v4884_v56, %s4364_s30  ;;  %v3887_v60 = vpop.f32.mrb[23].mxu1 }
 0xf46   : > { %v3640_v60 = vld [vmem:[%s5023_s4 + $0x40] sm:$0xff] }
 0xf47   : > { %2606 = vrot.lane.b32.xlu0 %v2347_v59, %s4358_s22  ;;  %3902 = vmatmul.mubr.msk.f32.vlgmr.msra.gmra.mrb[24].mxu1 %vm589_vm2, %v2347_v59 }
 0xf48   : > { %3906 = vmatprep.mubr.msk.f32.mxu1 %vm4356_vm0, %v4357_v1 }
 0xf4b   : > { %2772 = vrot.lane.b32.xlu0 %v2347_v59, %s4363_s27 }
 0xf4f   : > { %2938 = vrot.lane.b32.xlu0 %v2347_v59, %s4364_s30 }
 0xfaf   : > { %v2609_v61 = vpop.permute.xlu1 %2608 }
 0xfb0   : > { %3910 = vmatpush3.xpose.msk.msra.mxu0 %vm589_vm2, %v2609_v61  ;;  %v3641_v61 = vld [vmem:[%s5023_s4 + $0x48] sm:$0xff] }
 0xfb1   : > { %3919 = vmatprep.subr.mxu0 %v4357_v1 }
 0xfb3   : > { %v2775_v62 = vpop.permute.xlu1 %2774 }
 0xfb7   : > { %v2941_v3 = vpop.permute.xlu1 %2940 }
 0xfb9   : > { %v2607_v63 = vpop.permute.xlu0 %2606 }
 0xfba   : > { %3912 = vmatmul.mubr.msk.f32.vlgmr.msra.gmra.mrb[20].mxu0 %vm589_vm2, %v2607_v63  ;;  %v3642_v63 = vld [vmem:[%s5023_s4 + $0x50] sm:$0xff] }
 0xfbb   : > { %3920 = vmatpush3.xpose.msk.msra.mxu0 %vm589_vm2, %v2775_v62  ;;  %3921 = vmatprep.mubr.msk.f32.mxu0 %vm4356_vm0, %v4357_v1  ;;  %v4017_v62 = vpack.c.bf16 %v3641_v61, %v3640_v60 }
 0xfbc   : > { %3929 = vmatprep.subr.mxu0 %v4357_v1 }
 0xfbd   : > { %v2773_v2 = vpop.permute.xlu0 %2772 }
 0xfbe   : > { %3922 = vmatmul.mubr.msk.f32.vlgmr.msra.gmra.mrb[22].mxu0 %vm589_vm2, %v2773_v2  ;;  %v3643_v2 = vld [vmem:[%s5023_s4 + $0x58] sm:$0xff] }
 0xfbf   : > { %3930 = vmatpush3.xpose.msk.msra.mxu0 %vm589_vm2, %v2941_v3  ;;  %3931 = vmatprep.mubr.msk.f32.mxu0 %vm4356_vm0, %v4357_v1  ;;  %v4020_v3 = vpack.c.bf16 %v3643_v2, %v3642_v63 }
 0xfc0   : > { %4016 = vmatprep.subr.bf16.mxu0 %v4355_v0 }
 0xfc1   : > { %v2939_v4 = vpop.permute.xlu0 %2938 }
 0xfc2   : > { %3932 = vmatmul.mubr.msk.f32.vlgmr.msra.gmra.mrb[24].mxu0 %vm589_vm2, %v2939_v4 }
 0xfc3   : > { %3947 = vmatprep.mubr.msk.f32.mxu0 %vm4356_vm0, %v4357_v1  ;;  %4018 = vmatpush3.bf16.msra.mxu0 %v4017_v62 }
 0xfc4   : > { %4019 = vmatprep.subr.bf16.mxu0 %v4355_v0 }
 0xfc7   : > { %4021 = vmatpush3.bf16.msra.mxu0 %v4020_v3 }
 0xfc8   : > { %4028 = vmatprep.subr.bf16.mxu0 %v4355_v0 }
0x101a   : > { %v2514_v5 = vpop.f32.mrb[24].mxu1 }
0x101b   : > { %v2518_v6 = vmul.f32 0.35355338, %v2514_v5  ;;  %v3903_v7 = vpop.f32.mrb[25].mxu1 }
0x101d   : > { %v2519_v9 = vsel %vm589_vm2, %v2518_v6, -inf }
0x101e   : > { %2520 = vmax.xlane.f32.xlu1 %v2519_v9 }
0x108d   : > { %v2680_v10 = vpop.f32.mrb[20].mxu0 }
0x108e   : > { %v2684_v11 = vmul.f32 0.35355338, %v2680_v10  ;;  %v3913_v12 = vpop.f32.mrb[21].mxu0 }
0x1090   : > { %v2685_v13 = vsel %vm589_vm2, %v2684_v11, -inf }
0x1091   : > { %2686 = vmax.xlane.f32.xlu0 %v2685_v13  ;;  %v2846_v14 = vpop.f32.mrb[22].mxu0 }
0x1092   : > { %v2850_v15 = vmul.f32 0.35355338, %v2846_v14  ;;  %v3923_v16 = vpop.f32.mrb[23].mxu0 }
0x1094   : > { %v2851_v17 = vsel %vm589_vm2, %v2850_v15, -inf }
0x1095   : > { %2852 = vmax.xlane.f32.xlu0 %v2851_v17  ;;  %v3012_v18 = vpop.f32.mrb[24].mxu0  ;;  %v3644_v17 = vld [vmem:[#allocation4 + $0x2] ss:$0 sm:$0xff] }
0x1096   : > { %v3016_v19 = vmul.f32 0.35355338, %v3012_v18  ;;  %v3933_v20 = vpop.f32.mrb[25].mxu0 }
0x1098   : > { %v3017_v21 = vsel %vm589_vm2, %v3016_v19, -inf }
0x1099   : > { %3018 = vmax.xlane.f32.xlu1 %v3017_v21 }
0x10aa   : > { %2696 = vrot.lane.b32.xlu1 %v4884_v56, %s4361_s15 }
0x10ab   : > { %v2521_v22 = vpop.xlane.xlu1 %2520 }
0x10ac   : > { %v2522_v23 = vsub.f32 %v2518_v6, %v2521_v22 }
0x10ae   : > { %v2523_v24 = vmul.f32 1.442695, %v2522_v23 }
0x10b0   : > { %4166 = vpow2.f32 %v2523_v24 }
0x10ba   : > { %v4167_v25 = vpop.eup %4166 }
0x10bb   : > { %v2525_v26 = vsel %vm589_vm2, %v4167_v25, 0.0 }
0x10bc   : > { %2526 = vadd.xlane.f32.xlu0 %v2525_v26 }
0x10d2   : > { %2530 = vrot.lane.b32.xlu0 %v4884_v56, %s4359_s13 }
0x111e   : > { %v2687_v27 = vpop.xlane.xlu0 %2686 }
0x111f   : > { %v2688_v55 = vsub.f32 %v2684_v11, %v2687_v27 }
0x1121   : > { %v2689_v28 = vmul.f32 1.442695, %v2688_v55  ;;  %v3237_v55 = vld [vmem:[#allocation9] sm:$0xff] }
0x1122   : > { %v2853_v29 = vpop.xlane.xlu0 %2852 }
0x1123   : > { %4168 = vpow2.f32 %v2689_v28  ;;  %v2854_v30 = vsub.f32 %v2850_v15, %v2853_v29  ;;  %v3238_v28 = vld [vmem:[#allocation9 + $0x8] sm:$0xff] }
0x1124   : > { %v4023_v29 = vpack.c.bf16 %v3238_v28, %v3237_v55 }
0x1125   : > { %v2855_v31 = vmul.f32 1.442695, %v2854_v30  ;;  %v3240_v30 = vld [vmem:[#allocation9 + $0x18] sm:$0xff] }
0x1126   : > { %v3019_v32 = vpop.xlane.xlu1 %3018 }
0x1127   : > { %4170 = vpow2.f32 %v2855_v31  ;;  %v3020_v33 = vsub.f32 %v3016_v19, %v3019_v32  ;;  %v3323_v32 = vld [vmem:[%s5029_s10 + $0x8] sm:$0xff] }
0x1129   : > { %v3021_v34 = vmul.f32 1.442695, %v3020_v33  ;;  %v3324_v33 = vld [vmem:[%s5029_s10 + $0x10] sm:$0xff] }
0x112a   : > { %v2697_v8 = vpop.permute.xlu1 %2696 }
0x112b   : > { %4172 = vpow2.f32 %v3021_v34 }
0x112d   : > { %v4169_v35 = vpop.eup %4168 }
0x112e   : > { %v2691_v36 = vsel %vm589_vm2, %v4169_v35, 0.0 }
0x112f   : > { %2692 = vadd.xlane.f32.xlu1 %v2691_v36 }
0x1131   : > { %v4171_v37 = vpop.eup %4170 }
0x1132   : > { %v2857_v38 = vsel %vm589_vm2, %v4171_v37, 0.0 }
0x1133   : > { %2858 = vadd.xlane.f32.xlu0 %v2857_v38  ;;  %v3327_v38 = vld [vmem:[%s5029_s10 + $0x28] sm:$0xff] }
0x1135   : > { %v4173_v39 = vpop.eup %4172 }
0x1136   : > { %v3023_v40 = vsel %vm589_vm2, %v4173_v39, 0.0 }
0x1137   : > { %3024 = vadd.xlane.f32.xlu1 %v3023_v40 }
0x1148   : > { %2862 = vrot.lane.b32.xlu1 %v4884_v56, %s4360_s14 }
0x1149   : > { %3028 = vrot.lane.b32.xlu0 %v4884_v56, %s4362_s16  ;;  %v2527_v41 = vpop.xlane.xlu0 %2526 }
0x114a   : > { %4174 = vrcp.f32 %v2527_v41 }
0x114d   : > { %v2531_v42 = vpop.permute.xlu0 %2530 }
0x114e   : > { %3905 = vmatpush3.msra.mxu1 %v2531_v42 }
0x114f   : > { %3914 = vmatprep.subr.mxu1 %v4357_v1 }
0x1154   : > { %v4175_v43 = vpop.eup %4174 }
0x1155   : > { %v2529_v44 = vmul.f32 %v4175_v43, %v4167_v25 }
0x1157   : > { %3907 = vmatmul.mubr.msk.f32.vlgmr.msra.gmra.mrb[26].mxu1 %vm589_vm2, %v2529_v44  ;;  %v3646_v44 = vld [vmem:[#allocation6 + $0x1] ss:$0 sm:$0xff] }
0x1158   : > { %3915 = vmatpush3.msra.mxu1 %v2697_v8  ;;  %3916 = vmatprep.mubr.msk.f32.mxu1 %vm4356_vm0, %v4357_v1 }
0x1159   : > { %3924 = vmatprep.subr.mxu1 %v4357_v1 }
0x11bc   : > { %v2693_v45 = vpop.xlane.xlu1 %2692 }
0x11bd   : > { %4176 = vrcp.f32 %v2693_v45  ;;  %v3647_v45 = vld [vmem:[#allocation7 + $0x1] ss:$0 sm:$0xff] }
0x11c0   : > { %v2859_v46 = vpop.xlane.xlu0 %2858 }
0x11c1   : > { %4178 = vrcp.f32 %v2859_v46 }
0x11c4   : > { %v3025_v47 = vpop.xlane.xlu1 %3024  ;;  %v3029_v54 = vpop.permute.xlu0 %3028 }
0x11c5   : > { %4180 = vrcp.f32 %v3025_v47 }
0x11c7   : > { %v4177_v48 = vpop.eup %4176 }
0x11c8   : > { %v2695_v49 = vmul.f32 %v4177_v48, %v4169_v35  ;;  %v2863_v50 = vpop.permute.xlu1 %2862  ;;  %v3325_v35 = vld [vmem:[%s5029_s10 + $0x18] sm:$0xff]  ;;  %v3328_v48 = vld [vmem:[%s5029_s10 + $0x30] sm:$0xff] }
0x11c9   : > { %v4032_v36 = vpack.c.bf16 %v3325_v35, %v3324_v33 }
0x11ca   : > { %3917 = vmatmul.mubr.msk.f32.vlgmr.msra.gmra.mrb[28].mxu1 %vm589_vm2, %v2695_v49 }
0x11cb   : > { %v4179_v51 = vpop.eup %4178  ;;  %3925 = vmatpush3.msra.mxu1 %v2863_v50  ;;  %3926 = vmatprep.mubr.msk.f32.mxu1 %vm4356_vm0, %v4357_v1  ;;  %v3648_v50 = vld [vmem:[%s5028_s9] ss:$0 sm:$0xff] }
0x11cc   : > { %v2861_v53 = vmul.f32 %v4179_v51, %v4171_v37  ;;  %3934 = vmatprep.subr.mxu1 %v4357_v1  ;;  %v3326_v37 = vld [vmem:[%s5029_s10 + $0x20] sm:$0xff] }
0x11ce   : > { %3927 = vmatmul.mubr.msk.f32.vlgmr.msra.gmra.mrb[30].mxu1 %vm589_vm2, %v2861_v53 }
0x11cf   : > { %v4181_v56 = vpop.eup %4180  ;;  %3935 = vmatpush3.msra.mxu1 %v3029_v54  ;;  %3936 = vmatprep.mubr.msk.f32.mxu1 %vm4356_vm0, %v4357_v1 }
0x11d0   : > { %v3027_v57 = vmul.f32 %v4181_v56, %v4173_v39  ;;  %4022 = vmatprep.subr.bf16.mxu1 %v4355_v0  ;;  %v4035_v39 = vpack.c.bf16 %v3327_v38, %v3326_v37 }
0x11d2   : > { %3937 = vmatmul.mubr.msk.f32.vlgmr.msra.gmra.mrb[32].mxu1 %vm589_vm2, %v3027_v57  ;;  %v3650_v57 = vld [vmem:[%s5030_s11] ss:$0 sm:$0xff] }
0x11d3   : > { %3958 = vmatprep.mubr.msk.f32.mxu1 %vm4356_vm0, %v4357_v1  ;;  %4024 = vmatpush3.bf16.msra.mxu1 %v4023_v29 }
0x11d4   : > { %4025 = vmatprep.subr.bf16.mxu1 %v4355_v0 }
0x122a   : > { %v2602_v58 = vpop.f32.mrb[26].mxu1 }
0x122b   : > { %v3908_v59 = vpop.f32.mrb[27].mxu1 }
0x129d   : > { %v2768_v4 = vpop.f32.mrb[28].mxu1 }
0x129e   : > { %3105 = vrot.lane.b32.xlu1 %v2768_v4, %s5055_s17  ;;  %v3918_v5 = vpop.f32.mrb[29].mxu1 }
0x12a1   : > { %v2934_v6 = vpop.f32.mrb[30].mxu1 }
0x12a2   : > { %3109 = vrot.lane.b32.xlu0 %v2934_v6, %s5056_s21  ;;  %v3928_v7 = vpop.f32.mrb[31].mxu1 }
0x12a5   : > { %v3100_v9 = vpop.f32.mrb[32].mxu1 }
0x12a6   : > { %3113 = vrot.lane.b32.xlu1 %v3100_v9, %s5057_s23  ;;  %v3938_v10 = vpop.f32.mrb[33].mxu1 }
0x1310   : > { %v3106_v11 = vpop.permute.xlu1 %3105 }
0x1311   : > { %v3116_v13 = vsel %vm589_vm2, %v2602_v58, %v3106_v11  ;;  %v3652_v11 = vld [vmem:[#allocation6 + $0x2] ss:$0 sm:$0xff] }
0x1314   : > { %v3110_v12 = vpop.permute.xlu0 %3109 }
0x1315   : > { %v3117_v14 = vsel %vm1263_vm3, %v3116_v13, %v3110_v12  ;;  %v3653_v13 = vld [vmem:[#allocation7 + $0x2] ss:$0 sm:$0xff] }
0x1318   : > { %v3114_v15 = vpop.permute.xlu1 %3113 }
0x1319   : > { %v3118_v16 = vsel %vm1265_vm4, %v3117_v14, %v3114_v15 }
0x131a   : > { %3948 = vmatmul.mubr.msk.f32.vlgmr.msra.gmra.mrb[26].mxu0 %vm512_vm1, %v3118_v16 }
0x131b   : > { %3977 = vmatprep.mubr.msk.f32.mxu0 %vm4356_vm0, %v4357_v1  ;;  %v3239_v1 = vld [vmem:[#allocation9 + $0x10] sm:$0xff] }
0x131c   : > { %v4026_v31 = vpack.c.bf16 %v3240_v30, %v3239_v1 }
0x131e   : > { %4027 = vmatpush3.bf16.msra.mxu1 %v4026_v31 }
0x13ed   : > { %v3201_v18 = vpop.f32.mrb[26].mxu0 }
0x13ee   : > { %v3202_v19 = vadd.f32 %v3644_v17, %v3201_v18  ;;  %v3949_v20 = vpop.f32.mrb[27].mxu0 }
0x13f0   : > { %v3205_v21 = vadd.f32 %v3202_v19, %v4878_v52  ;;  %v3322_v52 = vld [vmem:[%s5029_s10] sm:$0xff] }
0x13f1   : > { %v4029_v34 = vpack.c.bf16 %v3323_v32, %v3322_v52 }
0x13f2   : > { %v3206_v22 = vsel %vm512_vm1, %v3205_v21, 0.0 }
0x13f3   : > { %3207 = vadd.xlane.f32.xlu0 %v3206_v22  ;;  %4030 = vmatpush3.bf16.msra.mxu0 %v4029_v34 }
0x13f4   : > { %4031 = vmatprep.subr.bf16.mxu0 %v4355_v0 }
0x13f7   : > { %4033 = vmatpush3.bf16.msra.mxu0 %v4032_v36 }
0x13f8   : > { %4034 = vmatprep.subr.bf16.mxu0 %v4355_v0 }
0x13fb   : > { %4036 = vmatpush3.bf16.msra.mxu0 %v4035_v39 }
0x13fc   : > { %4037 = vmatprep.subr.bf16.mxu0 %v4355_v0  ;;  %v3329_v0 = vld [vmem:[%s5029_s10 + $0x38] sm:$0xff] }
0x13fd   : > { %v4038_v49 = vpack.c.bf16 %v3329_v0, %v3328_v48 }
0x13ff   : > { %4039 = vmatpush3.bf16.msra.mxu0 %v4038_v49 }
0x1480   : > { %v3208_v23 = vpop.xlane.xlu0 %3207 }
0x1481   : > { %v3209_v24 = vmul.f32 0.03125, %v3208_v23 }
0x1483   : > { %v3210_v25 = vsub.f32 %v3205_v21, %v3209_v24 }
0x1485   : > { %v3211_v26 = vmul.f32 %v3210_v25, %v3210_v25 }
0x1487   : > { %v3212_v27 = vsel %vm512_vm1, %v3211_v26, 0.0 }
0x1488   : > { %3213 = vadd.xlane.f32.xlu1 %v3212_v27 }
0x1515   : > { %v3214_v40 = vpop.xlane.xlu1 %3213 }
0x1516   : > { %v3215_v41 = vmul.f32 0.03125, %v3214_v40 }
0x1518   : > { %v3216_v42 = vadd.f32 1e-05, %v3215_v41 }
0x151a   : > { %4182 = vrsqrt.f32 %v3216_v42 }
0x1524   : > { %v4183_v43 = vpop.eup %4182 }
0x1525   : > { %v3218_v8 = vmul.f32 %v4183_v43, %v3210_v25 }
0x1527   : > { %v3227_v46 = vmul.f32 %v3646_v44, %v3218_v8 }
0x1529   : > { %v3236_v47 = vadd.f32 %v3647_v45, %v3227_v46 }
0x152b   : > { %3959 = vmatmul.mubr.msk.f32.vlgmr.msra.gmra.mrb[34].mxu1 %vm512_vm1, %v3236_v47 }
0x15fe   : > { %v3317_v51 = vpop.f32.mrb[34].mxu1 }
0x15ff   : > { %v3318_v53 = vadd.f32 %v3648_v50, %v3317_v51  ;;  %v3960_v54 = vpop.f32.mrb[35].mxu1 }
0x1601   : > { %v3321_v56 = vmax.f32 %v3318_v53, 0.0 }
0x1603   : > { %3978 = vmatmul.mubr.msk.f32.vlgmr.msra.gmra.mrb[28].mxu0 %vm3337_vm5, %v3321_v56 }
0x16d6   : > { %v3407_v58 = vpop.f32.mrb[28].mxu0 }
0x16d7   : > { %v3408_v59 = vadd.f32 %v3650_v57, %v3407_v58  ;;  %v3979_v60 = vpop.f32.mrb[29].mxu0 }
0x16d9   : > { %v3411_v61 = vadd.f32 %v3408_v59, %v3236_v47 }
0x16db   : > { %v3412_v62 = vsel %vm512_vm1, %v3411_v61, 0.0 }
0x16dc   : > { %3413 = vadd.xlane.f32.xlu0 %v3412_v62 }
0x1769   : > { %v3414_v63 = vpop.xlane.xlu0 %3413 }
0x176a   : > { %v3415_v2 = vmul.f32 0.03125, %v3414_v63 }
0x176c   : > { %v3416_v3 = vsub.f32 %v3411_v61, %v3415_v2 }
0x176e   : > { %v3417_v4 = vmul.f32 %v3416_v3, %v3416_v3 }
0x1770   : > { %v3418_v5 = vsel %vm512_vm1, %v3417_v4, 0.0 }
0x1771   : > { %3419 = vadd.xlane.f32.xlu0 %v3418_v5 }
0x17fe   : > { %v3420_v6 = vpop.xlane.xlu0 %3419 }
0x17ff   : > { %v3421_v7 = vmul.f32 0.03125, %v3420_v6 }
0x1801   : > { %v3422_v9 = vadd.f32 1e-05, %v3421_v7 }
0x1803   : > { %4184 = vrsqrt.f32 %v3422_v9 }
0x180d   : > { %v4185_v10 = vpop.eup %4184 }
0x180e   : > { %v3424_v12 = vmul.f32 %v4185_v10, %v3416_v3 }
0x1810   : > { %v3433_v14 = vmul.f32 %v3652_v11, %v3424_v12 }
0x1812   : > { %v3442_v15 = vadd.f32 %v3653_v13, %v3433_v14 }
0x1814   : > { %3443 = vst.msk [vmem:[%s498_s29] sm:$0xff] %vm512_vm1, %v3442_v15 }
0x1815 PF: > { %s5059_s12 = sld [smem:[#allocation13_spill]] }
0x181b   : > { %s25_s21 = sadd.s32 1, %s5059_s12  }
0x181c   : > { %p22_p6 = scmp.ge.s32.totalorder %s25_s21, 4  }
0x181e   :  { %24 = sbr.rel (!%p22_p6) target bundleno = 5 (0x5), region = 136 }
0x1825   :  { %3463 = vsyncpa [#allocation3], 1 }
0x1826   :  { %3465 = vsyncpa [#allocation3 + $0x1], 1 }
0x1827   :  { %3466 = vsyncpa [#allocation5], 1 }
0x1828   :  { %3467 = vsyncpa [#allocation8], 1 }

</bundles_post_ra>
